<compile_context>
chip_gen: v7x
topology: tpu7x:2x2x1
jax: 0.10.0
libtpu: 0.0.40
codegen_flags: <defaults>
</compile_context>

<pallas_src>
import jax
import jax.numpy as jnp
from jax import lax
from jax.experimental import pallas as pl
from jax.experimental.pallas import tpu as pltpu


# ---------------------------------------------------------------------------
# Helpers
# ---------------------------------------------------------------------------
def _pick_bt(batch, bytes_per_batch_elem, vmem_budget=12 * 1024 * 1024):
    """Batch-tile per grid step: as large as the (double-buffered) VMEM budget
    allows, while keeping >= 2 grid steps when batch allows (v7x has 2 TCs and
    the pipeline needs >= 2 stages for DMA/compute overlap) and dividing batch
    exactly."""
    bt = int(max(1, min(batch, vmem_budget // max(1, bytes_per_batch_elem))))
    while bt > 1 and -(-batch // bt) < 2:        # keep >= 2 grid steps
        bt -= 1
    while batch % bt:                            # exact division (simplest)
        bt -= 1
    return bt


# ---------------------------------------------------------------------------
# Pallas kernel 1: fused  (MWCNN stand-in 3x3 'same' conv on [real, imag]
# channels)  +  data-consistency step:
#     k4  = conv3x3(k2)                       (cin=2, cout=2)
#     k   = k2 + k4
#     out = k - (k - origin) * dc_weight
# Taps are exact zero-padded window reads from a (H+2, W+2) VMEM halo scratch.
# ---------------------------------------------------------------------------
def _make_kspace_conv_dc_kernel(Bt, H, W):
    def kernel(w_ref, b_ref, dcw_ref,
               k2r_ref, k2i_ref, orr_ref, ori_ref,
               outr_ref, outi_ref, pad_ref):
        f32 = jnp.float32
        # Zero the halo scratch once per grid step; the border stays zero and the
        # interior is fully overwritten before every use.
        pad_ref[...] = jnp.zeros((H + 2, W + 2), f32)

        # Hoisted scalar loads (SMEM) -- not rebuilt inside the tap loops.
        wv = [w_ref[i] for i in range(36)]

        def wgt(co, cin, kh, kw):                # w[co, cin, kh, kw], row-major flat
            return wv[((co * 2 + cin) * 3 + kh) * 3 + kw]

        b0 = b_ref[0]
        b1 = b_ref[1]
        dcw = dcw_ref[0]

        for bi in range(Bt):
            k2r = k2r_ref[bi]                    # (H, W) f32
            k2i = k2i_ref[bi]

            # 3 independent partial accumulators per output channel: the 18-tap
            # reduction becomes a depth-6 chain instead of depth-18 (VALU ILP).
            accs_r = [None, None, None]
            accs_i = [None, None, None]
            for cin, x in ((0, k2r), (1, k2i)):
                pad_ref[pl.ds(1, H), pl.ds(1, W)] = x
                for kw in range(3):
                    for kh in range(3):
                        # tap[i, j] == x[i + kh - 1, j + kw - 1], zero-padded.
                        tap = pad_ref[pl.ds(kh, H), pl.ds(kw, W)]
                        pr = wgt(0, cin, kh, kw) * tap
                        pi = wgt(1, cin, kh, kw) * tap
                        accs_r[kw] = pr if accs_r[kw] is None else accs_r[kw] + pr
                        accs_i[kw] = pi if accs_i[kw] is None else accs_i[kw] + pi

            k4r = (accs_r[0] + accs_r[1]) + (accs_r[2] + b0)
            k4i = (accs_i[0] + accs_i[1]) + (accs_i[2] + b1)
            kr = k2r + k4r
            ki = k2i + k4i
            outr_ref[bi] = kr - (kr - orr_ref[bi]) * dcw
            outi_ref[bi] = ki - (ki - ori_ref[bi]) * dcw
    return kernel


def kspace_conv_dc_pallas(k2r, k2i, orr, ori, w, b, dc_weight):
    """k2*, or*: (B, H, W) f32 planes; w: (2, 2, 3, 3); b: (2,); dc_weight: scalar."""
    B, H, W = k2r.shape
    assert w.shape == (2, 2, 3, 3) and b.shape == (2,)
    f32 = jnp.float32

    wf = jnp.asarray(w, f32).reshape(-1)
    bf = jnp.asarray(b, f32).reshape(-1)
    dcw = jnp.reshape(jnp.asarray(dc_weight, f32), (1,))

    # 4 input planes + 2 output planes, double-buffered by the pipeline.
    Bt = _pick_bt(B, 6 * 2 * H * W * 4)
    grid = (B // Bt,)

    smem = pl.BlockSpec(memory_space=pltpu.MemorySpace.SMEM)
    plane = pl.BlockSpec((Bt, H, W), lambda g: (g, 0, 0))

    outr, outi = pl.pallas_call(
        _make_kspace_conv_dc_kernel(Bt, H, W),
        out_shape=(jax.ShapeDtypeStruct((B, H, W), f32),
                   jax.ShapeDtypeStruct((B, H, W), f32)),
        grid=grid,
        in_specs=[smem, smem, smem, plane, plane, plane, plane],
        out_specs=(plane, plane),
        scratch_shapes=[pltpu.VMEM((H + 2, W + 2), f32)],
        compiler_params=pltpu.CompilerParams(
            dimension_semantics=("parallel",),
            vmem_limit_bytes=32 * 1024 * 1024),
        cost_estimate=pl.CostEstimate(
            flops=78 * B * H * W,
            transcendentals=0,
            bytes_accessed=6 * B * H * W * 4),
    )(wf, bf, dcw,
      k2r.astype(f32), k2i.astype(f32), orr.astype(f32), ori.astype(f32))
    return outr, outi


# ---------------------------------------------------------------------------
# Pallas kernel 2: final Conv2d(2 -> 1, k=3, stride=2, pad=1) + |.|, computed
# directly at stride 2 on the vertical concat [image1 ; image2], per channel
# (real / imag).  Each conv-input channel is supplied as 4 even/odd quadrants
# per image half (8 per channel); the kernel stacks each (image1, image2)
# quadrant pair into a (2H+1? no: H+1, Wo+1) halo scratch so the concat
# geometry (including the window straddling the image1/image2 seam) and the
# top/left zero padding both come out of plain window reads.
# ---------------------------------------------------------------------------
def _make_final_conv_s2_kernel(Bt, Hq, Wo):
    H = 2 * Hq                                   # output rows == original image height

    def kernel(w_ref, b_ref,
               r1ee, r1eo, r1oe, r1oo, r2ee, r2eo, r2oe, r2oo,
               i1ee, i1eo, i1oe, i1oo, i2ee, i2eo, i2oe, i2oo,
               o_ref, pad_ref):
        f32 = jnp.float32
        pad_ref[...] = jnp.zeros((H + 1, Wo + 1), f32)

        wv = [w_ref[i] for i in range(18)]       # w[0, c, kh, kw] flat

        def wgt(c, kh, kw):
            return wv[(c * 3 + kh) * 3 + kw]

        bias = b_ref[0]

        chans = (
            (0, (r1ee, r1eo, r1oe, r1oo), (r2ee, r2eo, r2oe, r2oo)),
            (1, (i1ee, i1eo, i1oe, i1oo), (i2ee, i2eo, i2oe, i2oo)),
        )

        for bi in range(Bt):

            def fill(top_ref, bot_ref):
                # interior = vertical concat [image1-quadrant ; image2-quadrant]
                pad_ref[pl.ds(1, Hq), pl.ds(1, Wo)] = top_ref[bi]
                pad_ref[pl.ds(1 + Hq, Hq), pl.ds(1, Wo)] = bot_ref[bi]

            def win(r0, c0):
                # (r0, c0) = (1,1): quadrant itself; row 0 / col 0 are the zero pads,
                # so (0,1)=row i-1, (1,0)=col j-1, (0,0)=both shifted.
                return pad_ref[pl.ds(r0, H), pl.ds(c0, Wo)]

            parts = []
            for c, q1, q2 in chans:
                # ee quadrant: tap (1,1)
                fill(q1[0], q2[0])
                parts.append(wgt(c, 1, 1) * win(1, 1))
                # eo quadrant: taps (1,2) centre and (1,0) left-shift
                fill(q1[1], q2[1])
                parts.append(wgt(c, 1, 2) * win(1, 1) + wgt(c, 1, 0) * win(1, 0))
                # oe quadrant: taps (2,1) centre and (0,1) up-shift
                fill(q1[2], q2[2])
                parts.append(wgt(c, 2, 1) * win(1, 1) + wgt(c, 0, 1) * win(0, 1))
                # oo quadrant: taps (2,2), (2,0), (0,2), (0,0)
                fill(q1[3], q2[3])
                parts.append((wgt(c, 2, 2) * win(1, 1) + wgt(c, 2, 0) * win(1, 0))
                             + (wgt(c, 0, 2) * win(0, 1) + wgt(c, 0, 0) * win(0, 0)))

            total = ((parts[0] + parts[1]) + (parts[2] + parts[3])) + \
                    ((parts[4] + parts[5]) + (parts[6] + parts[7]))
            o_ref[bi, 0] = jnp.abs(total + bias)
    return kernel


def final_conv_s2_abs_pallas(image1, image2, w, b):
    """image1/image2: (B, H, W) complex; conv runs on cat([image1, image2], dim=1)."""
    B, H, W = image1.shape
    assert w.shape == (1, 2, 3, 3) and b.shape == (1,)
    # TODO(synk): odd spatial sizes would need one extra masked edge tap; fastMRI
    #             (and this test) use even sizes.
    assert H % 2 == 0 and W % 2 == 0
    Hq, Wo = H // 2, W // 2
    f32 = jnp.float32

    def quads(x):
        # Even/odd (row, col) split.  Lane-stride-2 gathers have no safe in-kernel
        # lowering, so this stays a wrapper-side XLA strided slice that reads the
        # complex sources directly (no intermediate concat pass).
        x = x.astype(f32)
        return (x[:, 0::2, 0::2], x[:, 0::2, 1::2], x[:, 1::2, 0::2], x[:, 1::2, 1::2])

    planes = (*quads(jnp.real(image1)), *quads(jnp.real(image2)),
              *quads(jnp.imag(image1)), *quads(jnp.imag(image2)))

    wf = jnp.asarray(w, f32).reshape(-1)
    bf = jnp.asarray(b, f32).reshape(-1)

    # 16 quadrant planes + 1 output block (= 2*Hq*Wo elems), double-buffered.
    Bt = _pick_bt(B, 18 * Hq * Wo * 4 * 2)
    grid = (B // Bt,)

    smem = pl.BlockSpec(memory_space=pltpu.MemorySpace.SMEM)
    qspec = pl.BlockSpec((Bt, Hq, Wo), lambda g: (g, 0, 0))
    ospec = pl.BlockSpec((Bt, 1, H, Wo), lambda g: (g, 0, 0, 0))

    return pl.pallas_call(
        _make_final_conv_s2_kernel(Bt, Hq, Wo),
        out_shape=jax.ShapeDtypeStruct((B, 1, H, Wo), f32),
        grid=grid,
        in_specs=[smem, smem] + [qspec] * 16,
        out_specs=ospec,
        scratch_shapes=[pltpu.VMEM((H + 1, Wo + 1), f32)],
        compiler_params=pltpu.CompilerParams(
            dimension_semantics=("parallel",),
            vmem_limit_bytes=32 * 1024 * 1024),
        cost_estimate=pl.CostEstimate(
            flops=38 * B * H * Wo,
            transcendentals=0,
            bytes_accessed=9 * B * H * Wo * 4),
    )(wf, bf, *planes)


# ---------------------------------------------------------------------------
# XPDNetBlock4 forward
# ---------------------------------------------------------------------------
def xpdnet_block4_forward(image, origin_kspace, params):
    # TODO(synk): FGDNet (img_model) definition was not provided -> identity stand-in.
    image1 = image

    # torch.fft.fftn on a 3-D tensor transforms ALL axes (incl. batch); mirrored here.
    kspace2 = jnp.fft.fftn(image1)

    # TODO(synk): MWCNN (kspace_model) definition was not provided -> single 3x3
    #             conv stand-in, fused with the data-consistency step.
    outr, outi = kspace_conv_dc_pallas(
        kspace2.real, kspace2.imag,
        origin_kspace.real, origin_kspace.imag,
        params["w_mwcnn"], params["b_mwcnn"], params["dc_weight"])
    kspace_output = lax.complex(outr, outi)

    image2 = jnp.fft.ifftn(kspace_output)

    # cat([image1, image2], dim=1) -> stack(real, imag) channels ->
    # Conv2d(2, 1, k=3, stride=2, pad=1) -> abs, all inside one Pallas kernel
    # (the concat geometry is realized in-kernel; no wrapper concat pass).
    image3 = final_conv_s2_abs_pallas(image1, image2,
                                      params["w_final"], params["b_final"])
    if image3.shape[-1] == 1:                    # torch.squeeze(dim=-1) semantics
        image3 = jnp.squeeze(image3, axis=-1)
    return image3


# ---------------------------------------------------------------------------
# Plain-JAX reference (mirrors the PyTorch forward) for the correctness check.
# ---------------------------------------------------------------------------
def _conv_ref(x, w, b, stride):
    y = lax.conv_general_dilated(
        x.astype(jnp.float32), w.astype(jnp.float32),
        window_strides=(stride, stride), padding=((1, 1), (1, 1)),
        dimension_numbers=("NCHW", "OIHW", "NCHW"),
        precision=lax.Precision.HIGHEST)
    return y + b.reshape(1, -1, 1, 1)


def xpdnet_block4_reference(image, origin_kspace, params):
    image1 = image
    kspace2 = jnp.fft.fftn(image1)
    kspace3 = jnp.transpose(jnp.stack([kspace2.real, kspace2.imag], -1), (0, 3, 1, 2))
    k_out = _conv_ref(kspace3, params["w_mwcnn"], params["b_mwcnn"], 1)
    kspace4c = jnp.transpose(k_out, (0, 2, 3, 1))
    kspace4 = kspace4c[..., 0] + 1j * kspace4c[..., 1]
    kspace_output = kspace2 + kspace4
    kspace5 = (kspace_output - origin_kspace) * params["dc_weight"]
    kspace_output = kspace_output - kspace5
    image2 = jnp.fft.ifftn(kspace_output)
    image3 = jnp.concatenate([image1, image2], axis=1)
    image3 = jnp.transpose(jnp.stack([image3.real, image3.imag], -1), (0, 3, 1, 2))
    image3 = _conv_ref(image3, params["w_final"], params["b_final"], 2)
    if image3.shape[-1] == 1:
        image3 = jnp.squeeze(image3, axis=-1)
    return jnp.abs(image3)


if __name__ == "__main__":
    B, H, W = 2, 16, 16
    key = jax.random.PRNGKey(0)
    k_ir, k_ii, k_or, k_oi, k_wm, k_bm, k_wf, k_bf = jax.random.split(key, 8)

    image = (jax.random.normal(k_ir, (B, H, W), jnp.float32)
             + 1j * jax.random.normal(k_ii, (B, H, W), jnp.float32)).astype(jnp.complex64)
    origin_kspace = (jax.random.normal(k_or, (B, H, W), jnp.float32)
                     + 1j * jax.random.normal(k_oi, (B, H, W), jnp.float32)).astype(jnp.complex64)

    params = {
        "w_mwcnn": 0.1 * jax.random.normal(k_wm, (2, 2, 3, 3), jnp.float32),
        "b_mwcnn": 0.1 * jax.random.normal(k_bm, (2,), jnp.float32),
        "w_final": 0.1 * jax.random.normal(k_wf, (1, 2, 3, 3), jnp.float32),
        "b_final": 0.1 * jax.random.normal(k_bf, (1,), jnp.float32),
        # Non-default value so the fused conv + DC path actually affects the output
        # (the module's default 1.0 makes the DC output equal origin_kspace exactly).
        "dc_weight": jnp.array(0.75, jnp.float32),
    }

    fwd = jax.jit(xpdnet_block4_forward)
    out = jax.block_until_ready(fwd(image, origin_kspace, params))
    ref = xpdnet_block4_reference(image, origin_kspace, params)

    assert out.shape == (B, 1, H, W // 2), out.shape
    max_err = float(jnp.max(jnp.abs(out - ref)))
    # All kernel math is plain f32 VPU arithmetic (no MXU data movement), so the
    # only differences vs. the HIGHEST-precision XLA reference are summation-order
    # effects; a mis-indexed tap would be O(0.1..1).
    assert jnp.allclose(out, ref, atol=1e-3, rtol=1e-3), max_err
    print("KERNEL_OK")
</pallas_src>

<mosaic_0001>
module attributes {stable_mosaic.version = 11 : i64} {
  func.func @kernel(%arg0: i32, %arg1: memref<36xf32, #tpu.memory_space<smem>>, %arg2: memref<2xf32, #tpu.memory_space<smem>>, %arg3: memref<1xf32, #tpu.memory_space<smem>>, %arg4: memref<1x16x16xf32, #tpu.memory_space<vmem>>, %arg5: memref<1x16x16xf32, #tpu.memory_space<vmem>>, %arg6: memref<1x16x16xf32, #tpu.memory_space<vmem>>, %arg7: memref<1x16x16xf32, #tpu.memory_space<vmem>>, %arg8: memref<1x16x16xf32, #tpu.memory_space<vmem>>, %arg9: memref<1x16x16xf32, #tpu.memory_space<vmem>>, %arg10: memref<18x18xf32, #tpu.memory_space<vmem>>) attributes {dimension_semantics = [#tpu.dimension_semantics<parallel>], iteration_bounds = array<i64: 2>, scalar_prefetch = 0 : i64, scratch_operands = 1 : i64, tpu.core_type = #tpu.core_type<tc>, window_params = [{transform_indices = @transform_0, window_bounds = array<i64: 36>}, {transform_indices = @transform_1, window_bounds = array<i64: 2>}, {transform_indices = @transform_2, window_bounds = array<i64: 1>}, {transform_indices = @transform_3, window_bounds = array<i64: 1, 16, 16>}, {transform_indices = @transform_4, window_bounds = array<i64: 1, 16, 16>}, {transform_indices = @transform_5, window_bounds = array<i64: 1, 16, 16>}, {transform_indices = @transform_6, window_bounds = array<i64: 1, 16, 16>}, {transform_indices = @transform_7, window_bounds = array<i64: 1, 16, 16>}, {transform_indices = @transform_8, window_bounds = array<i64: 1, 16, 16>}]} {
    %cst = arith.constant 0.000000e+00 : f32
    %0 = vector.broadcast %cst : f32 to vector<18x18xf32>
    %c0 = arith.constant 0 : index
    %c0_0 = arith.constant 0 : index
    %1 = vector.load %arg10[%c0, %c0_0] : memref<18x18xf32, #tpu.memory_space<vmem>>, vector<18x18xf32>
    tpu.vector_store %arg10[%c0, %c0_0], %0 {strides = array<i32>} : memref<18x18xf32, #tpu.memory_space<vmem>>, vector<18x18xf32>,
    %c0_1 = arith.constant 0 : index
    %2 = memref.load %arg1[%c0_1] : memref<36xf32, #tpu.memory_space<smem>>
    %c1 = arith.constant 1 : index
    %3 = memref.load %arg1[%c1] : memref<36xf32, #tpu.memory_space<smem>>
    %c2 = arith.constant 2 : index
    %4 = memref.load %arg1[%c2] : memref<36xf32, #tpu.memory_space<smem>>
    %c3 = arith.constant 3 : index
    %5 = memref.load %arg1[%c3] : memref<36xf32, #tpu.memory_space<smem>>
    %c4 = arith.constant 4 : index
    %6 = memref.load %arg1[%c4] : memref<36xf32, #tpu.memory_space<smem>>
    %c5 = arith.constant 5 : index
    %7 = memref.load %arg1[%c5] : memref<36xf32, #tpu.memory_space<smem>>
    %c6 = arith.constant 6 : index
    %8 = memref.load %arg1[%c6] : memref<36xf32, #tpu.memory_space<smem>>
    %c7 = arith.constant 7 : index
    %9 = memref.load %arg1[%c7] : memref<36xf32, #tpu.memory_space<smem>>
    %c8 = arith.constant 8 : index
    %10 = memref.load %arg1[%c8] : memref<36xf32, #tpu.memory_space<smem>>
    %c9 = arith.constant 9 : index
    %11 = memref.load %arg1[%c9] : memref<36xf32, #tpu.memory_space<smem>>
    %c10 = arith.constant 10 : index
    %12 = memref.load %arg1[%c10] : memref<36xf32, #tpu.memory_space<smem>>
    %c11 = arith.constant 11 : index
    %13 = memref.load %arg1[%c11] : memref<36xf32, #tpu.memory_space<smem>>
    %c12 = arith.constant 12 : index
    %14 = memref.load %arg1[%c12] : memref<36xf32, #tpu.memory_space<smem>>
    %c13 = arith.constant 13 : index
    %15 = memref.load %arg1[%c13] : memref<36xf32, #tpu.memory_space<smem>>
    %c14 = arith.constant 14 : index
    %16 = memref.load %arg1[%c14] : memref<36xf32, #tpu.memory_space<smem>>
    %c15 = arith.constant 15 : index
    %17 = memref.load %arg1[%c15] : memref<36xf32, #tpu.memory_space<smem>>
    %c16 = arith.constant 16 : index
    %18 = memref.load %arg1[%c16] : memref<36xf32, #tpu.memory_space<smem>>
    %c17 = arith.constant 17 : index
    %19 = memref.load %arg1[%c17] : memref<36xf32, #tpu.memory_space<smem>>
    %c18 = arith.constant 18 : index
    %20 = memref.load %arg1[%c18] : memref<36xf32, #tpu.memory_space<smem>>
    %c19 = arith.constant 19 : index
    %21 = memref.load %arg1[%c19] : memref<36xf32, #tpu.memory_space<smem>>
    %c20 = arith.constant 20 : index
    %22 = memref.load %arg1[%c20] : memref<36xf32, #tpu.memory_space<smem>>
    %c21 = arith.constant 21 : index
    %23 = memref.load %arg1[%c21] : memref<36xf32, #tpu.memory_space<smem>>
    %c22 = arith.constant 22 : index
    %24 = memref.load %arg1[%c22] : memref<36xf32, #tpu.memory_space<smem>>
    %c23 = arith.constant 23 : index
    %25 = memref.load %arg1[%c23] : memref<36xf32, #tpu.memory_space<smem>>
    %c24 = arith.constant 24 : index
    %26 = memref.load %arg1[%c24] : memref<36xf32, #tpu.memory_space<smem>>
    %c25 = arith.constant 25 : index
    %27 = memref.load %arg1[%c25] : memref<36xf32, #tpu.memory_space<smem>>
    %c26 = arith.constant 26 : index
    %28 = memref.load %arg1[%c26] : memref<36xf32, #tpu.memory_space<smem>>
    %c27 = arith.constant 27 : index
    %29 = memref.load %arg1[%c27] : memref<36xf32, #tpu.memory_space<smem>>
    %c28 = arith.constant 28 : index
    %30 = memref.load %arg1[%c28] : memref<36xf32, #tpu.memory_space<smem>>
    %c29 = arith.constant 29 : index
    %31 = memref.load %arg1[%c29] : memref<36xf32, #tpu.memory_space<smem>>
    %c30 = arith.constant 30 : index
    %32 = memref.load %arg1[%c30] : memref<36xf32, #tpu.memory_space<smem>>
    %c31 = arith.constant 31 : index
    %33 = memref.load %arg1[%c31] : memref<36xf32, #tpu.memory_space<smem>>
    %c32 = arith.constant 32 : index
    %34 = memref.load %arg1[%c32] : memref<36xf32, #tpu.memory_space<smem>>
    %c33 = arith.constant 33 : index
    %35 = memref.load %arg1[%c33] : memref<36xf32, #tpu.memory_space<smem>>
    %c34 = arith.constant 34 : index
    %36 = memref.load %arg1[%c34] : memref<36xf32, #tpu.memory_space<smem>>
    %c35 = arith.constant 35 : index
    %37 = memref.load %arg1[%c35] : memref<36xf32, #tpu.memory_space<smem>>
    %c0_2 = arith.constant 0 : index
    %38 = memref.load %arg2[%c0_2] : memref<2xf32, #tpu.memory_space<smem>>
    %c1_3 = arith.constant 1 : index
    %39 = memref.load %arg2[%c1_3] : memref<2xf32, #tpu.memory_space<smem>>
    %c0_4 = arith.constant 0 : index
    %40 = memref.load %arg3[%c0_4] : memref<1xf32, #tpu.memory_space<smem>>
    %c0_5 = arith.constant 0 : index
    %c0_6 = arith.constant 0 : index
    %c0_7 = arith.constant 0 : index
    %41 = vector.load %arg4[%c0_5, %c0_6, %c0_7] : memref<1x16x16xf32, #tpu.memory_space<vmem>>, vector<1x16x16xf32>
    %42 = vector.shape_cast %41 : vector<1x16x16xf32> to vector<16x16xf32>
    %c0_8 = arith.constant 0 : index
    %c0_9 = arith.constant 0 : index
    %c0_10 = arith.constant 0 : index
    %43 = vector.load %arg5[%c0_8, %c0_9, %c0_10] : memref<1x16x16xf32, #tpu.memory_space<vmem>>, vector<1x16x16xf32>
    %44 = vector.shape_cast %43 : vector<1x16x16xf32> to vector<16x16xf32>
    %c1_11 = arith.constant 1 : index
    %c1_12 = arith.constant 1 : index
    %45 = vector.load %arg10[%c1_11, %c1_12] : memref<18x18xf32, #tpu.memory_space<vmem>>, vector<16x16xf32>
    tpu.vector_store %arg10[%c1_11, %c1_12], %42 {strides = array<i32>} : memref<18x18xf32, #tpu.memory_space<vmem>>, vector<16x16xf32>,
    %c0_13 = arith.constant 0 : index
    %c0_14 = arith.constant 0 : index
    %46 = vector.load %arg10[%c0_13, %c0_14] : memref<18x18xf32, #tpu.memory_space<vmem>>, vector<16x16xf32>
    %47 = vector.broadcast %2 : f32 to vector<16x16xf32>
    %48 = arith.mulf %47, %46 : vector<16x16xf32>
    %49 = vector.broadcast %20 : f32 to vector<16x16xf32>
    %50 = arith.mulf %49, %46 : vector<16x16xf32>
    %c1_15 = arith.constant 1 : index
    %c0_16 = arith.constant 0 : index
    %51 = vector.load %arg10[%c1_15, %c0_16] : memref<18x18xf32, #tpu.memory_space<vmem>>, vector<16x16xf32>
    %52 = vector.broadcast %5 : f32 to vector<16x16xf32>
    %53 = arith.mulf %52, %51 : vector<16x16xf32>
    %54 = vector.broadcast %23 : f32 to vector<16x16xf32>
    %55 = arith.mulf %54, %51 : vector<16x16xf32>
    %56 = arith.addf %48, %53 : vector<16x16xf32>
    %57 = arith.addf %50, %55 : vector<16x16xf32>
    %c2_17 = arith.constant 2 : index
    %c0_18 = arith.constant 0 : index
    %58 = vector.load %arg10[%c2_17, %c0_18] : memref<18x18xf32, #tpu.memory_space<vmem>>, vector<16x16xf32>
    %59 = vector.broadcast %8 : f32 to vector<16x16xf32>
    %60 = arith.mulf %59, %58 : vector<16x16xf32>
    %61 = vector.broadcast %26 : f32 to vector<16x16xf32>
    %62 = arith.mulf %61, %58 : vector<16x16xf32>
    %63 = arith.addf %56, %60 : vector<16x16xf32>
    %64 = arith.addf %57, %62 : vector<16x16xf32>
    %c0_19 = arith.constant 0 : index
    %c1_20 = arith.constant 1 : index
    %65 = vector.load %arg10[%c0_19, %c1_20] : memref<18x18xf32, #tpu.memory_space<vmem>>, vector<16x16xf32>
    %66 = vector.broadcast %3 : f32 to vector<16x16xf32>
    %67 = arith.mulf %66, %65 : vector<16x16xf32>
    %68 = vector.broadcast %21 : f32 to vector<16x16xf32>
    %69 = arith.mulf %68, %65 : vector<16x16xf32>
    %c1_21 = arith.constant 1 : index
    %c1_22 = arith.constant 1 : index
    %70 = vector.load %arg10[%c1_21, %c1_22] : memref<18x18xf32, #tpu.memory_space<vmem>>, vector<16x16xf32>
    %71 = vector.broadcast %6 : f32 to vector<16x16xf32>
    %72 = arith.mulf %71, %70 : vector<16x16xf32>
    %73 = vector.broadcast %24 : f32 to vector<16x16xf32>
    %74 = arith.mulf %73, %70 : vector<16x16xf32>
    %75 = arith.addf %67, %72 : vector<16x16xf32>
    %76 = arith.addf %69, %74 : vector<16x16xf32>
    %c2_23 = arith.constant 2 : index
    %c1_24 = arith.constant 1 : index
    %77 = vector.load %arg10[%c2_23, %c1_24] : memref<18x18xf32, #tpu.memory_space<vmem>>, vector<16x16xf32>
    %78 = vector.broadcast %9 : f32 to vector<16x16xf32>
    %79 = arith.mulf %78, %77 : vector<16x16xf32>
    %80 = vector.broadcast %27 : f32 to vector<16x16xf32>
    %81 = arith.mulf %80, %77 : vector<16x16xf32>
    %82 = arith.addf %75, %79 : vector<16x16xf32>
    %83 = arith.addf %76, %81 : vector<16x16xf32>
    %c0_25 = arith.constant 0 : index
    %c2_26 = arith.constant 2 : index
    %84 = vector.load %arg10[%c0_25, %c2_26] : memref<18x18xf32, #tpu.memory_space<vmem>>, vector<16x16xf32>
    %85 = vector.broadcast %4 : f32 to vector<16x16xf32>
    %86 = arith.mulf %85, %84 : vector<16x16xf32>
    %87 = vector.broadcast %22 : f32 to vector<16x16xf32>
    %88 = arith.mulf %87, %84 : vector<16x16xf32>
    %c1_27 = arith.constant 1 : index
    %c2_28 = arith.constant 2 : index
    %89 = vector.load %arg10[%c1_27, %c2_28] : memref<18x18xf32, #tpu.memory_space<vmem>>, vector<16x16xf32>
    %90 = vector.broadcast %7 : f32 to vector<16x16xf32>
    %91 = arith.mulf %90, %89 : vector<16x16xf32>
    %92 = vector.broadcast %25 : f32 to vector<16x16xf32>
    %93 = arith.mulf %92, %89 : vector<16x16xf32>
    %94 = arith.addf %86, %91 : vector<16x16xf32>
    %95 = arith.addf %88, %93 : vector<16x16xf32>
    %c2_29 = arith.constant 2 : index
    %c2_30 = arith.constant 2 : index
    %96 = vector.load %arg10[%c2_29, %c2_30] : memref<18x18xf32, #tpu.memory_space<vmem>>, vector<16x16xf32>
    %97 = vector.broadcast %10 : f32 to vector<16x16xf32>
    %98 = arith.mulf %97, %96 : vector<16x16xf32>
    %99 = vector.broadcast %28 : f32 to vector<16x16xf32>
    %100 = arith.mulf %99, %96 : vector<16x16xf32>
    %101 = arith.addf %94, %98 : vector<16x16xf32>
    %102 = arith.addf %95, %100 : vector<16x16xf32>
    %c1_31 = arith.constant 1 : index
    %c1_32 = arith.constant 1 : index
    %103 = vector.load %arg10[%c1_31, %c1_32] : memref<18x18xf32, #tpu.memory_space<vmem>>, vector<16x16xf32>
    tpu.vector_store %arg10[%c1_31, %c1_32], %44 {strides = array<i32>} : memref<18x18xf32, #tpu.memory_space<vmem>>, vector<16x16xf32>,
    %c0_33 = arith.constant 0 : index
    %c0_34 = arith.constant 0 : index
    %104 = vector.load %arg10[%c0_33, %c0_34] : memref<18x18xf32, #tpu.memory_space<vmem>>, vector<16x16xf32>
    %105 = vector.broadcast %11 : f32 to vector<16x16xf32>
    %106 = arith.mulf %105, %104 : vector<16x16xf32>
    %107 = vector.broadcast %29 : f32 to vector<16x16xf32>
    %108 = arith.mulf %107, %104 : vector<16x16xf32>
    %109 = arith.addf %63, %106 : vector<16x16xf32>
    %110 = arith.addf %64, %108 : vector<16x16xf32>
    %c1_35 = arith.constant 1 : index
    %c0_36 = arith.constant 0 : index
    %111 = vector.load %arg10[%c1_35, %c0_36] : memref<18x18xf32, #tpu.memory_space<vmem>>, vector<16x16xf32>
    %112 = vector.broadcast %14 : f32 to vector<16x16xf32>
    %113 = arith.mulf %112, %111 : vector<16x16xf32>
    %114 = vector.broadcast %32 : f32 to vector<16x16xf32>
    %115 = arith.mulf %114, %111 : vector<16x16xf32>
    %116 = arith.addf %109, %113 : vector<16x16xf32>
    %117 = arith.addf %110, %115 : vector<16x16xf32>
    %c2_37 = arith.constant 2 : index
    %c0_38 = arith.constant 0 : index
    %118 = vector.load %arg10[%c2_37, %c0_38] : memref<18x18xf32, #tpu.memory_space<vmem>>, vector<16x16xf32>
    %119 = vector.broadcast %17 : f32 to vector<16x16xf32>
    %120 = arith.mulf %119, %118 : vector<16x16xf32>
    %121 = vector.broadcast %35 : f32 to vector<16x16xf32>
    %122 = arith.mulf %121, %118 : vector<16x16xf32>
    %123 = arith.addf %116, %120 : vector<16x16xf32>
    %124 = arith.addf %117, %122 : vector<16x16xf32>
    %c0_39 = arith.constant 0 : index
    %c1_40 = arith.constant 1 : index
    %125 = vector.load %arg10[%c0_39, %c1_40] : memref<18x18xf32, #tpu.memory_space<vmem>>, vector<16x16xf32>
    %126 = vector.broadcast %12 : f32 to vector<16x16xf32>
    %127 = arith.mulf %126, %125 : vector<16x16xf32>
    %128 = vector.broadcast %30 : f32 to vector<16x16xf32>
    %129 = arith.mulf %128, %125 : vector<16x16xf32>
    %130 = arith.addf %82, %127 : vector<16x16xf32>
    %131 = arith.addf %83, %129 : vector<16x16xf32>
    %c1_41 = arith.constant 1 : index
    %c1_42 = arith.constant 1 : index
    %132 = vector.load %arg10[%c1_41, %c1_42] : memref<18x18xf32, #tpu.memory_space<vmem>>, vector<16x16xf32>
    %133 = vector.broadcast %15 : f32 to vector<16x16xf32>
    %134 = arith.mulf %133, %132 : vector<16x16xf32>
    %135 = vector.broadcast %33 : f32 to vector<16x16xf32>
    %136 = arith.mulf %135, %132 : vector<16x16xf32>
    %137 = arith.addf %130, %134 : vector<16x16xf32>
    %138 = arith.addf %131, %136 : vector<16x16xf32>
    %c2_43 = arith.constant 2 : index
    %c1_44 = arith.constant 1 : index
    %139 = vector.load %arg10[%c2_43, %c1_44] : memref<18x18xf32, #tpu.memory_space<vmem>>, vector<16x16xf32>
    %140 = vector.broadcast %18 : f32 to vector<16x16xf32>
    %141 = arith.mulf %140, %139 : vector<16x16xf32>
    %142 = vector.broadcast %36 : f32 to vector<16x16xf32>
    %143 = arith.mulf %142, %139 : vector<16x16xf32>
    %144 = arith.addf %137, %141 : vector<16x16xf32>
    %145 = arith.addf %138, %143 : vector<16x16xf32>
    %c0_45 = arith.constant 0 : index
    %c2_46 = arith.constant 2 : index
    %146 = vector.load %arg10[%c0_45, %c2_46] : memref<18x18xf32, #tpu.memory_space<vmem>>, vector<16x16xf32>
    %147 = vector.broadcast %13 : f32 to vector<16x16xf32>
    %148 = arith.mulf %147, %146 : vector<16x16xf32>
    %149 = vector.broadcast %31 : f32 to vector<16x16xf32>
    %150 = arith.mulf %149, %146 : vector<16x16xf32>
    %151 = arith.addf %101, %148 : vector<16x16xf32>
    %152 = arith.addf %102, %150 : vector<16x16xf32>
    %c1_47 = arith.constant 1 : index
    %c2_48 = arith.constant 2 : index
    %153 = vector.load %arg10[%c1_47, %c2_48] : memref<18x18xf32, #tpu.memory_space<vmem>>, vector<16x16xf32>
    %154 = vector.broadcast %16 : f32 to vector<16x16xf32>
    %155 = arith.mulf %154, %153 : vector<16x16xf32>
    %156 = vector.broadcast %34 : f32 to vector<16x16xf32>
    %157 = arith.mulf %156, %153 : vector<16x16xf32>
    %158 = arith.addf %151, %155 : vector<16x16xf32>
    %159 = arith.addf %152, %157 : vector<16x16xf32>
    %c2_49 = arith.constant 2 : index
    %c2_50 = arith.constant 2 : index
    %160 = vector.load %arg10[%c2_49, %c2_50] : memref<18x18xf32, #tpu.memory_space<vmem>>, vector<16x16xf32>
    %161 = vector.broadcast %19 : f32 to vector<16x16xf32>
    %162 = arith.mulf %161, %160 : vector<16x16xf32>
    %163 = vector.broadcast %37 : f32 to vector<16x16xf32>
    %164 = arith.mulf %163, %160 : vector<16x16xf32>
    %165 = arith.addf %158, %162 : vector<16x16xf32>
    %166 = arith.addf %159, %164 : vector<16x16xf32>
    %167 = arith.addf %123, %144 : vector<16x16xf32>
    %168 = vector.broadcast %38 : f32 to vector<16x16xf32>
    %169 = arith.addf %165, %168 : vector<16x16xf32>
    %170 = arith.addf %167, %169 : vector<16x16xf32>
    %171 = arith.addf %124, %145 : vector<16x16xf32>
    %172 = vector.broadcast %39 : f32 to vector<16x16xf32>
    %173 = arith.addf %166, %172 : vector<16x16xf32>
    %174 = arith.addf %171, %173 : vector<16x16xf32>
    %175 = arith.addf %42, %170 : vector<16x16xf32>
    %176 = arith.addf %44, %174 : vector<16x16xf32>
    %c0_51 = arith.constant 0 : index
    %c0_52 = arith.constant 0 : index
    %c0_53 = arith.constant 0 : index
    %177 = vector.load %arg6[%c0_51, %c0_52, %c0_53] : memref<1x16x16xf32, #tpu.memory_space<vmem>>, vector<1x16x16xf32>
    %178 = vector.shape_cast %177 : vector<1x16x16xf32> to vector<16x16xf32>
    %179 = arith.subf %175, %178 : vector<16x16xf32>
    %180 = vector.broadcast %40 : f32 to vector<16x16xf32>
    %181 = arith.mulf %179, %180 : vector<16x16xf32>
    %182 = arith.subf %175, %181 : vector<16x16xf32>
    %c0_54 = arith.constant 0 : index
    %c0_55 = arith.constant 0 : index
    %c0_56 = arith.constant 0 : index
    %183 = vector.load %arg8[%c0_54, %c0_55, %c0_56] : memref<1x16x16xf32, #tpu.memory_space<vmem>>, vector<1x16x16xf32>
    %184 = vector.shape_cast %183 : vector<1x16x16xf32> to vector<16x16xf32>
    %185 = vector.shape_cast %182 : vector<16x16xf32> to vector<1x16x16xf32>
    tpu.vector_store %arg8[%c0_54, %c0_55, %c0_56], %185 {strides = array<i32>} : memref<1x16x16xf32, #tpu.memory_space<vmem>>, vector<1x16x16xf32>,
    %c0_57 = arith.constant 0 : index
    %c0_58 = arith.constant 0 : index
    %c0_59 = arith.constant 0 : index
    %186 = vector.load %arg7[%c0_57, %c0_58, %c0_59] : memref<1x16x16xf32, #tpu.memory_space<vmem>>, vector<1x16x16xf32>
    %187 = vector.shape_cast %186 : vector<1x16x16xf32> to vector<16x16xf32>
    %188 = arith.subf %176, %187 : vector<16x16xf32>
    %189 = vector.broadcast %40 : f32 to vector<16x16xf32>
    %190 = arith.mulf %188, %189 : vector<16x16xf32>
    %191 = arith.subf %176, %190 : vector<16x16xf32>
    %c0_60 = arith.constant 0 : index
    %c0_61 = arith.constant 0 : index
    %c0_62 = arith.constant 0 : index
    %192 = vector.load %arg9[%c0_60, %c0_61, %c0_62] : memref<1x16x16xf32, #tpu.memory_space<vmem>>, vector<1x16x16xf32>
    %193 = vector.shape_cast %192 : vector<1x16x16xf32> to vector<16x16xf32>
    %194 = vector.shape_cast %191 : vector<16x16xf32> to vector<1x16x16xf32>
    tpu.vector_store %arg9[%c0_60, %c0_61, %c0_62], %194 {strides = array<i32>} : memref<1x16x16xf32, #tpu.memory_space<vmem>>, vector<1x16x16xf32>,
    return
  }
  func.func @transform_0(%arg0: i32) -> i32 {
    %c0_i32 = arith.constant 0 : i32
    %c0_i32_0 = arith.constant 0 : i32
    return %c0_i32 : i32
  }
  func.func @transform_1(%arg0: i32) -> i32 {
    %c0_i32 = arith.constant 0 : i32
    %c0_i32_0 = arith.constant 0 : i32
    return %c0_i32 : i32
  }
  func.func @transform_2(%arg0: i32) -> i32 {
    %c0_i32 = arith.constant 0 : i32
    %c0_i32_0 = arith.constant 0 : i32
    return %c0_i32 : i32
  }
  func.func @transform_3(%arg0: i32) -> (i32, i32, i32) {
    %c0_i32 = arith.constant 0 : i32
    %c0_i32_0 = arith.constant 0 : i32
    %c0_i32_1 = arith.constant 0 : i32
    return %arg0, %c0_i32, %c0_i32_0 : i32, i32, i32
  }
  func.func @transform_4(%arg0: i32) -> (i32, i32, i32) {
    %c0_i32 = arith.constant 0 : i32
    %c0_i32_0 = arith.constant 0 : i32
    %c0_i32_1 = arith.constant 0 : i32
    return %arg0, %c0_i32, %c0_i32_0 : i32, i32, i32
  }
  func.func @transform_5(%arg0: i32) -> (i32, i32, i32) {
    %c0_i32 = arith.constant 0 : i32
    %c0_i32_0 = arith.constant 0 : i32
    %c0_i32_1 = arith.constant 0 : i32
    return %arg0, %c0_i32, %c0_i32_0 : i32, i32, i32
  }
  func.func @transform_6(%arg0: i32) -> (i32, i32, i32) {
    %c0_i32 = arith.constant 0 : i32
    %c0_i32_0 = arith.constant 0 : i32
    %c0_i32_1 = arith.constant 0 : i32
    return %arg0, %c0_i32, %c0_i32_0 : i32, i32, i32
  }
  func.func @transform_7(%arg0: i32) -> (i32, i32, i32) {
    %c0_i32 = arith.constant 0 : i32
    %c0_i32_0 = arith.constant 0 : i32
    %c0_i32_1 = arith.constant 0 : i32
    return %arg0, %c0_i32, %c0_i32_0 : i32, i32, i32
  }
  func.func @transform_8(%arg0: i32) -> (i32, i32, i32) {
    %c0_i32 = arith.constant 0 : i32
    %c0_i32_0 = arith.constant 0 : i32
    %c0_i32_1 = arith.constant 0 : i32
    return %arg0, %c0_i32, %c0_i32_0 : i32, i32, i32
  }
}

module attributes {stable_mosaic.version = 11 : i64} {
  func.func @kernel(%arg0: i32, %arg1: memref<18xf32, #tpu.memory_space<smem>>, %arg2: memref<1xf32, #tpu.memory_space<smem>>, %arg3: memref<1x8x8xf32, #tpu.memory_space<vmem>>, %arg4: memref<1x8x8xf32, #tpu.memory_space<vmem>>, %arg5: memref<1x8x8xf32, #tpu.memory_space<vmem>>, %arg6: memref<1x8x8xf32, #tpu.memory_space<vmem>>, %arg7: memref<1x8x8xf32, #tpu.memory_space<vmem>>, %arg8: memref<1x8x8xf32, #tpu.memory_space<vmem>>, %arg9: memref<1x8x8xf32, #tpu.memory_space<vmem>>, %arg10: memref<1x8x8xf32, #tpu.memory_space<vmem>>, %arg11: memref<1x8x8xf32, #tpu.memory_space<vmem>>, %arg12: memref<1x8x8xf32, #tpu.memory_space<vmem>>, %arg13: memref<1x8x8xf32, #tpu.memory_space<vmem>>, %arg14: memref<1x8x8xf32, #tpu.memory_space<vmem>>, %arg15: memref<1x8x8xf32, #tpu.memory_space<vmem>>, %arg16: memref<1x8x8xf32, #tpu.memory_space<vmem>>, %arg17: memref<1x8x8xf32, #tpu.memory_space<vmem>>, %arg18: memref<1x8x8xf32, #tpu.memory_space<vmem>>, %arg19: memref<1x1x16x8xf32, #tpu.memory_space<vmem>>, %arg20: memref<17x9xf32, #tpu.memory_space<vmem>>) attributes {dimension_semantics = [#tpu.dimension_semantics<parallel>], iteration_bounds = array<i64: 2>, scalar_prefetch = 0 : i64, scratch_operands = 1 : i64, tpu.core_type = #tpu.core_type<tc>, window_params = [{transform_indices = @transform_0, window_bounds = array<i64: 18>}, {transform_indices = @transform_1, window_bounds = array<i64: 1>}, {transform_indices = @transform_2, window_bounds = array<i64: 1, 8, 8>}, {transform_indices = @transform_3, window_bounds = array<i64: 1, 8, 8>}, {transform_indices = @transform_4, window_bounds = array<i64: 1, 8, 8>}, {transform_indices = @transform_5, window_bounds = array<i64: 1, 8, 8>}, {transform_indices = @transform_6, window_bounds = array<i64: 1, 8, 8>}, {transform_indices = @transform_7, window_bounds = array<i64: 1, 8, 8>}, {transform_indices = @transform_8, window_bounds = array<i64: 1, 8, 8>}, {transform_indices = @transform_9, window_bounds = array<i64: 1, 8, 8>}, {transform_indices = @transform_10, window_bounds = array<i64: 1, 8, 8>}, {transform_indices = @transform_11, window_bounds = array<i64: 1, 8, 8>}, {transform_indices = @transform_12, window_bounds = array<i64: 1, 8, 8>}, {transform_indices = @transform_13, window_bounds = array<i64: 1, 8, 8>}, {transform_indices = @transform_14, window_bounds = array<i64: 1, 8, 8>}, {transform_indices = @transform_15, window_bounds = array<i64: 1, 8, 8>}, {transform_indices = @transform_16, window_bounds = array<i64: 1, 8, 8>}, {transform_indices = @transform_17, window_bounds = array<i64: 1, 8, 8>}, {transform_indices = @transform_18, window_bounds = array<i64: 1, 1, 16, 8>}]} {
    %cst = arith.constant 0.000000e+00 : f32
    %0 = vector.broadcast %cst : f32 to vector<17x9xf32>
    %c0 = arith.constant 0 : index
    %c0_0 = arith.constant 0 : index
    %1 = vector.load %arg20[%c0, %c0_0] : memref<17x9xf32, #tpu.memory_space<vmem>>, vector<17x9xf32>
    tpu.vector_store %arg20[%c0, %c0_0], %0 {strides = array<i32>} : memref<17x9xf32, #tpu.memory_space<vmem>>, vector<17x9xf32>,
    %c0_1 = arith.constant 0 : index
    %2 = memref.load %arg1[%c0_1] : memref<18xf32, #tpu.memory_space<smem>>
    %c1 = arith.constant 1 : index
    %3 = memref.load %arg1[%c1] : memref<18xf32, #tpu.memory_space<smem>>
    %c2 = arith.constant 2 : index
    %4 = memref.load %arg1[%c2] : memref<18xf32, #tpu.memory_space<smem>>
    %c3 = arith.constant 3 : index
    %5 = memref.load %arg1[%c3] : memref<18xf32, #tpu.memory_space<smem>>
    %c4 = arith.constant 4 : index
    %6 = memref.load %arg1[%c4] : memref<18xf32, #tpu.memory_space<smem>>
    %c5 = arith.constant 5 : index
    %7 = memref.load %arg1[%c5] : memref<18xf32, #tpu.memory_space<smem>>
    %c6 = arith.constant 6 : index
    %8 = memref.load %arg1[%c6] : memref<18xf32, #tpu.memory_space<smem>>
    %c7 = arith.constant 7 : index
    %9 = memref.load %arg1[%c7] : memref<18xf32, #tpu.memory_space<smem>>
    %c8 = arith.constant 8 : index
    %10 = memref.load %arg1[%c8] : memref<18xf32, #tpu.memory_space<smem>>
    %c9 = arith.constant 9 : index
    %11 = memref.load %arg1[%c9] : memref<18xf32, #tpu.memory_space<smem>>
    %c10 = arith.constant 10 : index
    %12 = memref.load %arg1[%c10] : memref<18xf32, #tpu.memory_space<smem>>
    %c11 = arith.constant 11 : index
    %13 = memref.load %arg1[%c11] : memref<18xf32, #tpu.memory_space<smem>>
    %c12 = arith.constant 12 : index
    %14 = memref.load %arg1[%c12] : memref<18xf32, #tpu.memory_space<smem>>
    %c13 = arith.constant 13 : index
    %15 = memref.load %arg1[%c13] : memref<18xf32, #tpu.memory_space<smem>>
    %c14 = arith.constant 14 : index
    %16 = memref.load %arg1[%c14] : memref<18xf32, #tpu.memory_space<smem>>
    %c15 = arith.constant 15 : index
    %17 = memref.load %arg1[%c15] : memref<18xf32, #tpu.memory_space<smem>>
    %c16 = arith.constant 16 : index
    %18 = memref.load %arg1[%c16] : memref<18xf32, #tpu.memory_space<smem>>
    %c17 = arith.constant 17 : index
    %19 = memref.load %arg1[%c17] : memref<18xf32, #tpu.memory_space<smem>>
    %c0_2 = arith.constant 0 : index
    %20 = memref.load %arg2[%c0_2] : memref<1xf32, #tpu.memory_space<smem>>
    %c0_3 = arith.constant 0 : index
    %c0_4 = arith.constant 0 : index
    %c0_5 = arith.constant 0 : index
    %21 = vector.load %arg3[%c0_3, %c0_4, %c0_5] : memref<1x8x8xf32, #tpu.memory_space<vmem>>, vector<1x8x8xf32>
    %22 = vector.shape_cast %21 : vector<1x8x8xf32> to vector<8x8xf32>
    %c1_6 = arith.constant 1 : index
    %c1_7 = arith.constant 1 : index
    %23 = vector.load %arg20[%c1_6, %c1_7] : memref<17x9xf32, #tpu.memory_space<vmem>>, vector<8x8xf32>
    tpu.vector_store %arg20[%c1_6, %c1_7], %22 {strides = array<i32>} : memref<17x9xf32, #tpu.memory_space<vmem>>, vector<8x8xf32>,
    %c0_8 = arith.constant 0 : index
    %c0_9 = arith.constant 0 : index
    %c0_10 = arith.constant 0 : index
    %24 = vector.load %arg7[%c0_8, %c0_9, %c0_10] : memref<1x8x8xf32, #tpu.memory_space<vmem>>, vector<1x8x8xf32>
    %25 = vector.shape_cast %24 : vector<1x8x8xf32> to vector<8x8xf32>
    %c9_11 = arith.constant 9 : index
    %c1_12 = arith.constant 1 : index
    %26 = vector.load %arg20[%c9_11, %c1_12] : memref<17x9xf32, #tpu.memory_space<vmem>>, vector<8x8xf32>
    tpu.vector_store %arg20[%c9_11, %c1_12], %25 {strides = array<i32>} : memref<17x9xf32, #tpu.memory_space<vmem>>, vector<8x8xf32>,
    %c1_13 = arith.constant 1 : index
    %c1_14 = arith.constant 1 : index
    %27 = vector.load %arg20[%c1_13, %c1_14] : memref<17x9xf32, #tpu.memory_space<vmem>>, vector<16x8xf32>
    %28 = vector.broadcast %6 : f32 to vector<16x8xf32>
    %29 = arith.mulf %28, %27 : vector<16x8xf32>
    %c0_15 = arith.constant 0 : index
    %c0_16 = arith.constant 0 : index
    %c0_17 = arith.constant 0 : index
    %30 = vector.load %arg4[%c0_15, %c0_16, %c0_17] : memref<1x8x8xf32, #tpu.memory_space<vmem>>, vector<1x8x8xf32>
    %31 = vector.shape_cast %30 : vector<1x8x8xf32> to vector<8x8xf32>
    %c1_18 = arith.constant 1 : index
    %c1_19 = arith.constant 1 : index
    %32 = vector.load %arg20[%c1_18, %c1_19] : memref<17x9xf32, #tpu.memory_space<vmem>>, vector<8x8xf32>
    tpu.vector_store %arg20[%c1_18, %c1_19], %31 {strides = array<i32>} : memref<17x9xf32, #tpu.memory_space<vmem>>, vector<8x8xf32>,
    %c0_20 = arith.constant 0 : index
    %c0_21 = arith.constant 0 : index
    %c0_22 = arith.constant 0 : index
    %33 = vector.load %arg8[%c0_20, %c0_21, %c0_22] : memref<1x8x8xf32, #tpu.memory_space<vmem>>, vector<1x8x8xf32>
    %34 = vector.shape_cast %33 : vector<1x8x8xf32> to vector<8x8xf32>
    %c9_23 = arith.constant 9 : index
    %c1_24 = arith.constant 1 : index
    %35 = vector.load %arg20[%c9_23, %c1_24] : memref<17x9xf32, #tpu.memory_space<vmem>>, vector<8x8xf32>
    tpu.vector_store %arg20[%c9_23, %c1_24], %34 {strides = array<i32>} : memref<17x9xf32, #tpu.memory_space<vmem>>, vector<8x8xf32>,
    %c1_25 = arith.constant 1 : index
    %c1_26 = arith.constant 1 : index
    %36 = vector.load %arg20[%c1_25, %c1_26] : memref<17x9xf32, #tpu.memory_space<vmem>>, vector<16x8xf32>
    %37 = vector.broadcast %7 : f32 to vector<16x8xf32>
    %38 = arith.mulf %37, %36 : vector<16x8xf32>
    %c1_27 = arith.constant 1 : index
    %c0_28 = arith.constant 0 : index
    %39 = vector.load %arg20[%c1_27, %c0_28] : memref<17x9xf32, #tpu.memory_space<vmem>>, vector<16x8xf32>
    %40 = vector.broadcast %5 : f32 to vector<16x8xf32>
    %41 = arith.mulf %40, %39 : vector<16x8xf32>
    %42 = arith.addf %38, %41 : vector<16x8xf32>
    %c0_29 = arith.constant 0 : index
    %c0_30 = arith.constant 0 : index
    %c0_31 = arith.constant 0 : index
    %43 = vector.load %arg5[%c0_29, %c0_30, %c0_31] : memref<1x8x8xf32, #tpu.memory_space<vmem>>, vector<1x8x8xf32>
    %44 = vector.shape_cast %43 : vector<1x8x8xf32> to vector<8x8xf32>
    %c1_32 = arith.constant 1 : index
    %c1_33 = arith.constant 1 : index
    %45 = vector.load %arg20[%c1_32, %c1_33] : memref<17x9xf32, #tpu.memory_space<vmem>>, vector<8x8xf32>
    tpu.vector_store %arg20[%c1_32, %c1_33], %44 {strides = array<i32>} : memref<17x9xf32, #tpu.memory_space<vmem>>, vector<8x8xf32>,
    %c0_34 = arith.constant 0 : index
    %c0_35 = arith.constant 0 : index
    %c0_36 = arith.constant 0 : index
    %46 = vector.load %arg9[%c0_34, %c0_35, %c0_36] : memref<1x8x8xf32, #tpu.memory_space<vmem>>, vector<1x8x8xf32>
    %47 = vector.shape_cast %46 : vector<1x8x8xf32> to vector<8x8xf32>
    %c9_37 = arith.constant 9 : index
    %c1_38 = arith.constant 1 : index
    %48 = vector.load %arg20[%c9_37, %c1_38] : memref<17x9xf32, #tpu.memory_space<vmem>>, vector<8x8xf32>
    tpu.vector_store %arg20[%c9_37, %c1_38], %47 {strides = array<i32>} : memref<17x9xf32, #tpu.memory_space<vmem>>, vector<8x8xf32>,
    %c1_39 = arith.constant 1 : index
    %c1_40 = arith.constant 1 : index
    %49 = vector.load %arg20[%c1_39, %c1_40] : memref<17x9xf32, #tpu.memory_space<vmem>>, vector<16x8xf32>
    %50 = vector.broadcast %9 : f32 to vector<16x8xf32>
    %51 = arith.mulf %50, %49 : vector<16x8xf32>
    %c0_41 = arith.constant 0 : index
    %c1_42 = arith.constant 1 : index
    %52 = vector.load %arg20[%c0_41, %c1_42] : memref<17x9xf32, #tpu.memory_space<vmem>>, vector<16x8xf32>
    %53 = vector.broadcast %3 : f32 to vector<16x8xf32>
    %54 = arith.mulf %53, %52 : vector<16x8xf32>
    %55 = arith.addf %51, %54 : vector<16x8xf32>
    %c0_43 = arith.constant 0 : index
    %c0_44 = arith.constant 0 : index
    %c0_45 = arith.constant 0 : index
    %56 = vector.load %arg6[%c0_43, %c0_44, %c0_45] : memref<1x8x8xf32, #tpu.memory_space<vmem>>, vector<1x8x8xf32>
    %57 = vector.shape_cast %56 : vector<1x8x8xf32> to vector<8x8xf32>
    %c1_46 = arith.constant 1 : index
    %c1_47 = arith.constant 1 : index
    %58 = vector.load %arg20[%c1_46, %c1_47] : memref<17x9xf32, #tpu.memory_space<vmem>>, vector<8x8xf32>
    tpu.vector_store %arg20[%c1_46, %c1_47], %57 {strides = array<i32>} : memref<17x9xf32, #tpu.memory_space<vmem>>, vector<8x8xf32>,
    %c0_48 = arith.constant 0 : index
    %c0_49 = arith.constant 0 : index
    %c0_50 = arith.constant 0 : index
    %59 = vector.load %arg10[%c0_48, %c0_49, %c0_50] : memref<1x8x8xf32, #tpu.memory_space<vmem>>, vector<1x8x8xf32>
    %60 = vector.shape_cast %59 : vector<1x8x8xf32> to vector<8x8xf32>
    %c9_51 = arith.constant 9 : index
    %c1_52 = arith.constant 1 : index
    %61 = vector.load %arg20[%c9_51, %c1_52] : memref<17x9xf32, #tpu.memory_space<vmem>>, vector<8x8xf32>
    tpu.vector_store %arg20[%c9_51, %c1_52], %60 {strides = array<i32>} : memref<17x9xf32, #tpu.memory_space<vmem>>, vector<8x8xf32>,
    %c1_53 = arith.constant 1 : index
    %c1_54 = arith.constant 1 : index
    %62 = vector.load %arg20[%c1_53, %c1_54] : memref<17x9xf32, #tpu.memory_space<vmem>>, vector<16x8xf32>
    %63 = vector.broadcast %10 : f32 to vector<16x8xf32>
    %64 = arith.mulf %63, %62 : vector<16x8xf32>
    %c1_55 = arith.constant 1 : index
    %c0_56 = arith.constant 0 : index
    %65 = vector.load %arg20[%c1_55, %c0_56] : memref<17x9xf32, #tpu.memory_space<vmem>>, vector<16x8xf32>
    %66 = vector.broadcast %8 : f32 to vector<16x8xf32>
    %67 = arith.mulf %66, %65 : vector<16x8xf32>
    %68 = arith.addf %64, %67 : vector<16x8xf32>
    %c0_57 = arith.constant 0 : index
    %c1_58 = arith.constant 1 : index
    %69 = vector.load %arg20[%c0_57, %c1_58] : memref<17x9xf32, #tpu.memory_space<vmem>>, vector<16x8xf32>
    %70 = vector.broadcast %4 : f32 to vector<16x8xf32>
    %71 = arith.mulf %70, %69 : vector<16x8xf32>
    %c0_59 = arith.constant 0 : index
    %c0_60 = arith.constant 0 : index
    %72 = vector.load %arg20[%c0_59, %c0_60] : memref<17x9xf32, #tpu.memory_space<vmem>>, vector<16x8xf32>
    %73 = vector.broadcast %2 : f32 to vector<16x8xf32>
    %74 = arith.mulf %73, %72 : vector<16x8xf32>
    %75 = arith.addf %71, %74 : vector<16x8xf32>
    %76 = arith.addf %68, %75 : vector<16x8xf32>
    %c0_61 = arith.constant 0 : index
    %c0_62 = arith.constant 0 : index
    %c0_63 = arith.constant 0 : index
    %77 = vector.load %arg11[%c0_61, %c0_62, %c0_63] : memref<1x8x8xf32, #tpu.memory_space<vmem>>, vector<1x8x8xf32>
    %78 = vector.shape_cast %77 : vector<1x8x8xf32> to vector<8x8xf32>
    %c1_64 = arith.constant 1 : index
    %c1_65 = arith.constant 1 : index
    %79 = vector.load %arg20[%c1_64, %c1_65] : memref<17x9xf32, #tpu.memory_space<vmem>>, vector<8x8xf32>
    tpu.vector_store %arg20[%c1_64, %c1_65], %78 {strides = array<i32>} : memref<17x9xf32, #tpu.memory_space<vmem>>, vector<8x8xf32>,
    %c0_66 = arith.constant 0 : index
    %c0_67 = arith.constant 0 : index
    %c0_68 = arith.constant 0 : index
    %80 = vector.load %arg15[%c0_66, %c0_67, %c0_68] : memref<1x8x8xf32, #tpu.memory_space<vmem>>, vector<1x8x8xf32>
    %81 = vector.shape_cast %80 : vector<1x8x8xf32> to vector<8x8xf32>
    %c9_69 = arith.constant 9 : index
    %c1_70 = arith.constant 1 : index
    %82 = vector.load %arg20[%c9_69, %c1_70] : memref<17x9xf32, #tpu.memory_space<vmem>>, vector<8x8xf32>
    tpu.vector_store %arg20[%c9_69, %c1_70], %81 {strides = array<i32>} : memref<17x9xf32, #tpu.memory_space<vmem>>, vector<8x8xf32>,
    %c1_71 = arith.constant 1 : index
    %c1_72 = arith.constant 1 : index
    %83 = vector.load %arg20[%c1_71, %c1_72] : memref<17x9xf32, #tpu.memory_space<vmem>>, vector<16x8xf32>
    %84 = vector.broadcast %15 : f32 to vector<16x8xf32>
    %85 = arith.mulf %84, %83 : vector<16x8xf32>
    %c0_73 = arith.constant 0 : index
    %c0_74 = arith.constant 0 : index
    %c0_75 = arith.constant 0 : index
    %86 = vector.load %arg12[%c0_73, %c0_74, %c0_75] : memref<1x8x8xf32, #tpu.memory_space<vmem>>, vector<1x8x8xf32>
    %87 = vector.shape_cast %86 : vector<1x8x8xf32> to vector<8x8xf32>
    %c1_76 = arith.constant 1 : index
    %c1_77 = arith.constant 1 : index
    %88 = vector.load %arg20[%c1_76, %c1_77] : memref<17x9xf32, #tpu.memory_space<vmem>>, vector<8x8xf32>
    tpu.vector_store %arg20[%c1_76, %c1_77], %87 {strides = array<i32>} : memref<17x9xf32, #tpu.memory_space<vmem>>, vector<8x8xf32>,
    %c0_78 = arith.constant 0 : index
    %c0_79 = arith.constant 0 : index
    %c0_80 = arith.constant 0 : index
    %89 = vector.load %arg16[%c0_78, %c0_79, %c0_80] : memref<1x8x8xf32, #tpu.memory_space<vmem>>, vector<1x8x8xf32>
    %90 = vector.shape_cast %89 : vector<1x8x8xf32> to vector<8x8xf32>
    %c9_81 = arith.constant 9 : index
    %c1_82 = arith.constant 1 : index
    %91 = vector.load %arg20[%c9_81, %c1_82] : memref<17x9xf32, #tpu.memory_space<vmem>>, vector<8x8xf32>
    tpu.vector_store %arg20[%c9_81, %c1_82], %90 {strides = array<i32>} : memref<17x9xf32, #tpu.memory_space<vmem>>, vector<8x8xf32>,
    %c1_83 = arith.constant 1 : index
    %c1_84 = arith.constant 1 : index
    %92 = vector.load %arg20[%c1_83, %c1_84] : memref<17x9xf32, #tpu.memory_space<vmem>>, vector<16x8xf32>
    %93 = vector.broadcast %16 : f32 to vector<16x8xf32>
    %94 = arith.mulf %93, %92 : vector<16x8xf32>
    %c1_85 = arith.constant 1 : index
    %c0_86 = arith.constant 0 : index
    %95 = vector.load %arg20[%c1_85, %c0_86] : memref<17x9xf32, #tpu.memory_space<vmem>>, vector<16x8xf32>
    %96 = vector.broadcast %14 : f32 to vector<16x8xf32>
    %97 = arith.mulf %96, %95 : vector<16x8xf32>
    %98 = arith.addf %94, %97 : vector<16x8xf32>
    %c0_87 = arith.constant 0 : index
    %c0_88 = arith.constant 0 : index
    %c0_89 = arith.constant 0 : index
    %99 = vector.load %arg13[%c0_87, %c0_88, %c0_89] : memref<1x8x8xf32, #tpu.memory_space<vmem>>, vector<1x8x8xf32>
    %100 = vector.shape_cast %99 : vector<1x8x8xf32> to vector<8x8xf32>
    %c1_90 = arith.constant 1 : index
    %c1_91 = arith.constant 1 : index
    %101 = vector.load %arg20[%c1_90, %c1_91] : memref<17x9xf32, #tpu.memory_space<vmem>>, vector<8x8xf32>
    tpu.vector_store %arg20[%c1_90, %c1_91], %100 {strides = array<i32>} : memref<17x9xf32, #tpu.memory_space<vmem>>, vector<8x8xf32>,
    %c0_92 = arith.constant 0 : index
    %c0_93 = arith.constant 0 : index
    %c0_94 = arith.constant 0 : index
    %102 = vector.load %arg17[%c0_92, %c0_93, %c0_94] : memref<1x8x8xf32, #tpu.memory_space<vmem>>, vector<1x8x8xf32>
    %103 = vector.shape_cast %102 : vector<1x8x8xf32> to vector<8x8xf32>
    %c9_95 = arith.constant 9 : index
    %c1_96 = arith.constant 1 : index
    %104 = vector.load %arg20[%c9_95, %c1_96] : memref<17x9xf32, #tpu.memory_space<vmem>>, vector<8x8xf32>
    tpu.vector_store %arg20[%c9_95, %c1_96], %103 {strides = array<i32>} : memref<17x9xf32, #tpu.memory_space<vmem>>, vector<8x8xf32>,
    %c1_97 = arith.constant 1 : index
    %c1_98 = arith.constant 1 : index
    %105 = vector.load %arg20[%c1_97, %c1_98] : memref<17x9xf32, #tpu.memory_space<vmem>>, vector<16x8xf32>
    %106 = vector.broadcast %18 : f32 to vector<16x8xf32>
    %107 = arith.mulf %106, %105 : vector<16x8xf32>
    %c0_99 = arith.constant 0 : index
    %c1_100 = arith.constant 1 : index
    %108 = vector.load %arg20[%c0_99, %c1_100] : memref<17x9xf32, #tpu.memory_space<vmem>>, vector<16x8xf32>
    %109 = vector.broadcast %12 : f32 to vector<16x8xf32>
    %110 = arith.mulf %109, %108 : vector<16x8xf32>
    %111 = arith.addf %107, %110 : vector<16x8xf32>
    %c0_101 = arith.constant 0 : index
    %c0_102 = arith.constant 0 : index
    %c0_103 = arith.constant 0 : index
    %112 = vector.load %arg14[%c0_101, %c0_102, %c0_103] : memref<1x8x8xf32, #tpu.memory_space<vmem>>, vector<1x8x8xf32>
    %113 = vector.shape_cast %112 : vector<1x8x8xf32> to vector<8x8xf32>
    %c1_104 = arith.constant 1 : index
    %c1_105 = arith.constant 1 : index
    %114 = vector.load %arg20[%c1_104, %c1_105] : memref<17x9xf32, #tpu.memory_space<vmem>>, vector<8x8xf32>
    tpu.vector_store %arg20[%c1_104, %c1_105], %113 {strides = array<i32>} : memref<17x9xf32, #tpu.memory_space<vmem>>, vector<8x8xf32>,
    %c0_106 = arith.constant 0 : index
    %c0_107 = arith.constant 0 : index
    %c0_108 = arith.constant 0 : index
    %115 = vector.load %arg18[%c0_106, %c0_107, %c0_108] : memref<1x8x8xf32, #tpu.memory_space<vmem>>, vector<1x8x8xf32>
    %116 = vector.shape_cast %115 : vector<1x8x8xf32> to vector<8x8xf32>
    %c9_109 = arith.constant 9 : index
    %c1_110 = arith.constant 1 : index
    %117 = vector.load %arg20[%c9_109, %c1_110] : memref<17x9xf32, #tpu.memory_space<vmem>>, vector<8x8xf32>
    tpu.vector_store %arg20[%c9_109, %c1_110], %116 {strides = array<i32>} : memref<17x9xf32, #tpu.memory_space<vmem>>, vector<8x8xf32>,
    %c1_111 = arith.constant 1 : index
    %c1_112 = arith.constant 1 : index
    %118 = vector.load %arg20[%c1_111, %c1_112] : memref<17x9xf32, #tpu.memory_space<vmem>>, vector<16x8xf32>
    %119 = vector.broadcast %19 : f32 to vector<16x8xf32>
    %120 = arith.mulf %119, %118 : vector<16x8xf32>
    %c1_113 = arith.constant 1 : index
    %c0_114 = arith.constant 0 : index
    %121 = vector.load %arg20[%c1_113, %c0_114] : memref<17x9xf32, #tpu.memory_space<vmem>>, vector<16x8xf32>
    %122 = vector.broadcast %17 : f32 to vector<16x8xf32>
    %123 = arith.mulf %122, %121 : vector<16x8xf32>
    %124 = arith.addf %120, %123 : vector<16x8xf32>
    %c0_115 = arith.constant 0 : index
    %c1_116 = arith.constant 1 : index
    %125 = vector.load %arg20[%c0_115, %c1_116] : memref<17x9xf32, #tpu.memory_space<vmem>>, vector<16x8xf32>
    %126 = vector.broadcast %13 : f32 to vector<16x8xf32>
    %127 = arith.mulf %126, %125 : vector<16x8xf32>
    %c0_117 = arith.constant 0 : index
    %c0_118 = arith.constant 0 : index
    %128 = vector.load %arg20[%c0_117, %c0_118] : memref<17x9xf32, #tpu.memory_space<vmem>>, vector<16x8xf32>
    %129 = vector.broadcast %11 : f32 to vector<16x8xf32>
    %130 = arith.mulf %129, %128 : vector<16x8xf32>
    %131 = arith.addf %127, %130 : vector<16x8xf32>
    %132 = arith.addf %124, %131 : vector<16x8xf32>
    %133 = arith.addf %29, %42 : vector<16x8xf32>
    %134 = arith.addf %55, %76 : vector<16x8xf32>
    %135 = arith.addf %133, %134 : vector<16x8xf32>
    %136 = arith.addf %85, %98 : vector<16x8xf32>
    %137 = arith.addf %111, %132 : vector<16x8xf32>
    %138 = arith.addf %136, %137 : vector<16x8xf32>
    %139 = arith.addf %135, %138 : vector<16x8xf32>
    %140 = vector.broadcast %20 : f32 to vector<16x8xf32>
    %141 = arith.addf %139, %140 : vector<16x8xf32>
    %142 = math.absf %141 : vector<16x8xf32>
    %c0_119 = arith.constant 0 : index
    %c0_120 = arith.constant 0 : index
    %c0_121 = arith.constant 0 : index
    %c0_122 = arith.constant 0 : index
    %143 = vector.load %arg19[%c0_119, %c0_120, %c0_121, %c0_122] : memref<1x1x16x8xf32, #tpu.memory_space<vmem>>, vector<1x1x16x8xf32>
    %144 = vector.shape_cast %143 : vector<1x1x16x8xf32> to vector<16x8xf32>
    %145 = vector.shape_cast %142 : vector<16x8xf32> to vector<1x1x16x8xf32>
    tpu.vector_store %arg19[%c0_119, %c0_120, %c0_121, %c0_122], %145 {strides = array<i32>} : memref<1x1x16x8xf32, #tpu.memory_space<vmem>>, vector<1x1x16x8xf32>,
    return
  }
  func.func @transform_0(%arg0: i32) -> i32 {
    %c0_i32 = arith.constant 0 : i32
    %c0_i32_0 = arith.constant 0 : i32
    return %c0_i32 : i32
  }
  func.func @transform_1(%arg0: i32) -> i32 {
    %c0_i32 = arith.constant 0 : i32
    %c0_i32_0 = arith.constant 0 : i32
    return %c0_i32 : i32
  }
  func.func @transform_2(%arg0: i32) -> (i32, i32, i32) {
    %c0_i32 = arith.constant 0 : i32
    %c0_i32_0 = arith.constant 0 : i32
    %c0_i32_1 = arith.constant 0 : i32
    return %arg0, %c0_i32, %c0_i32_0 : i32, i32, i32
  }
  func.func @transform_3(%arg0: i32) -> (i32, i32, i32) {
    %c0_i32 = arith.constant 0 : i32
    %c0_i32_0 = arith.constant 0 : i32
    %c0_i32_1 = arith.constant 0 : i32
    return %arg0, %c0_i32, %c0_i32_0 : i32, i32, i32
  }
  func.func @transform_4(%arg0: i32) -> (i32, i32, i32) {
    %c0_i32 = arith.constant 0 : i32
    %c0_i32_0 = arith.constant 0 : i32
    %c0_i32_1 = arith.constant 0 : i32
    return %arg0, %c0_i32, %c0_i32_0 : i32, i32, i32
  }
  func.func @transform_5(%arg0: i32) -> (i32, i32, i32) {
    %c0_i32 = arith.constant 0 : i32
    %c0_i32_0 = arith.constant 0 : i32
    %c0_i32_1 = arith.constant 0 : i32
    return %arg0, %c0_i32, %c0_i32_0 : i32, i32, i32
  }
  func.func @transform_6(%arg0: i32) -> (i32, i32, i32) {
    %c0_i32 = arith.constant 0 : i32
    %c0_i32_0 = arith.constant 0 : i32
    %c0_i32_1 = arith.constant 0 : i32
    return %arg0, %c0_i32, %c0_i32_0 : i32, i32, i32
  }
  func.func @transform_7(%arg0: i32) -> (i32, i32, i32) {
    %c0_i32 = arith.constant 0 : i32
    %c0_i32_0 = arith.constant 0 : i32
    %c0_i32_1 = arith.constant 0 : i32
    return %arg0, %c0_i32, %c0_i32_0 : i32, i32, i32
  }
  func.func @transform_8(%arg0: i32) -> (i32, i32, i32) {
    %c0_i32 = arith.constant 0 : i32
    %c0_i32_0 = arith.constant 0 : i32
    %c0_i32_1 = arith.constant 0 : i32
    return %arg0, %c0_i32, %c0_i32_0 : i32, i32, i32
  }
  func.func @transform_9(%arg0: i32) -> (i32, i32, i32) {
    %c0_i32 = arith.constant 0 : i32
    %c0_i32_0 = arith.constant 0 : i32
    %c0_i32_1 = arith.constant 0 : i32
    return %arg0, %c0_i32, %c0_i32_0 : i32, i32, i32
  }
  func.func @transform_10(%arg0: i32) -> (i32, i32, i32) {
    %c0_i32 = arith.constant 0 : i32
    %c0_i32_0 = arith.constant 0 : i32
    %c0_i32_1 = arith.constant 0 : i32
    return %arg0, %c0_i32, %c0_i32_0 : i32, i32, i32
  }
  func.func @transform_11(%arg0: i32) -> (i32, i32, i32) {
    %c0_i32 = arith.constant 0 : i32
    %c0_i32_0 = arith.constant 0 : i32
    %c0_i32_1 = arith.constant 0 : i32
    return %arg0, %c0_i32, %c0_i32_0 : i32, i32, i32
  }
  func.func @transform_12(%arg0: i32) -> (i32, i32, i32) {
    %c0_i32 = arith.constant 0 : i32
    %c0_i32_0 = arith.constant 0 : i32
    %c0_i32_1 = arith.constant 0 : i32
    return %arg0, %c0_i32, %c0_i32_0 : i32, i32, i32
  }
  func.func @transform_13(%arg0: i32) -> (i32, i32, i32) {
    %c0_i32 = arith.constant 0 : i32
    %c0_i32_0 = arith.constant 0 : i32
    %c0_i32_1 = arith.constant 0 : i32
    return %arg0, %c0_i32, %c0_i32_0 : i32, i32, i32
  }
  func.func @transform_14(%arg0: i32) -> (i32, i32, i32) {
    %c0_i32 = arith.constant 0 : i32
    %c0_i32_0 = arith.constant 0 : i32
    %c0_i32_1 = arith.constant 0 : i32
    return %arg0, %c0_i32, %c0_i32_0 : i32, i32, i32
  }
  func.func @transform_15(%arg0: i32) -> (i32, i32, i32) {
    %c0_i32 = arith.constant 0 : i32
    %c0_i32_0 = arith.constant 0 : i32
    %c0_i32_1 = arith.constant 0 : i32
    return %arg0, %c0_i32, %c0_i32_0 : i32, i32, i32
  }
  func.func @transform_16(%arg0: i32) -> (i32, i32, i32) {
    %c0_i32 = arith.constant 0 : i32
    %c0_i32_0 = arith.constant 0 : i32
    %c0_i32_1 = arith.constant 0 : i32
    return %arg0, %c0_i32, %c0_i32_0 : i32, i32, i32
  }
  func.func @transform_17(%arg0: i32) -> (i32, i32, i32) {
    %c0_i32 = arith.constant 0 : i32
    %c0_i32_0 = arith.constant 0 : i32
    %c0_i32_1 = arith.constant 0 : i32
    return %arg0, %c0_i32, %c0_i32_0 : i32, i32, i32
  }
  func.func @transform_18(%arg0: i32) -> (i32, i32, i32, i32) {
    %c0_i32 = arith.constant 0 : i32
    %c0_i32_0 = arith.constant 0 : i32
    %c0_i32_1 = arith.constant 0 : i32
    %c0_i32_2 = arith.constant 0 : i32
    return %arg0, %c0_i32, %c0_i32_0, %c0_i32_1 : i32, i32, i32, i32
  }
}

</mosaic_0001>

<bundles_post_ra>
// kernel: custom-call.1
= control target key start
LH: loop header
LB: loop body
LE: loop exit
PB: predicated region body
PF: predicated region fallthrough
CT: control target
= control target key end

     0   :  { %s59_s0 = inlined_call_operand.hbm [shape: c64[2,16,16], index: 0, kind: input, shape index: {}]   ;;  %s60_s1 = inlined_call_operand.vmem [shape: f32[2,16,16], index: 1, kind: output, shape index: {}]  }
   0x1   :  { %s2_s8 = scalar_lea.hbm %s59_s0, 512 }
   0x2   :  { %3 = vsyncpa [#allocation0], 0  ;;  %s4_s11 = sshll.u32 %s60_s1, 4  ;;  %s34_s14 = scalar_lea.hbm %s59_s0, 1024  ;;  %s5_s11 = int_to_ptr.vmem [resolvable:$true] %s4_s11 }
   0x3   :  { %p11_p0 = scmp.ne.s32.totalorder %s2_s8, %s34_s14  ;;  %p13_p1 = scmp.lt.u32.totalorder %s2_s8, %s59_s0 }
   0x4   :  { %p14_p2 = scmp.lt.u32.totalorder %s34_s14, %s34_s14  ;;  %p16_p4 = scmp.lt.u32.totalorder %s34_s14, %s2_s8 }
   0x6   :  { %p15_p3 = por %p14_p2, %p13_p1 }
   0x8   :  { %p17_p5 = por %p16_p4, %p15_p3 }
   0xa   :  { %p18_p6 = pnand %p17_p5, %p11_p0 }
   0xc   :  { %21 = shalt.err (!%p18_p6)  }
   0xd   :  { %s22_s17 = scalar_lea.vmem %s5_s11, 512  ;;  %p27_p8 = scmp.lt.s32.totalorder %s5_s11, %s5_s11 }
   0xe   :  { %p23_p7 = scmp.ne.s32.totalorder %s5_s11, %s22_s17  ;;  %p28_p9 = scmp.lt.s32.totalorder %s22_s17, %s22_s17 }
  0x10   :  { %p29_p10 = por %p28_p9, %p27_p8 }
  0x12   :  { %p30_p11 = pnand %p29_p10, %p23_p7 }
  0x14   :  { %33 = shalt.err (!%p30_p11)  }
  0x15   :  { %7 = dma.hbm_to_vmem [thread:$0]  %s2_s8, 512, %s5_s11, [#allocation0] }
  0x16   :  { %35 = dma.done.wait [#allocation0], 512  }
  0x17   :  { %36 = vsyncadd [#allocation0], 4294966784 }
  0x18   :  { %9 = vsyncpa [#allocation0], 1 }

// kernel: custom-call
= control target key start
LH: loop header
LB: loop body
LE: loop exit
PB: predicated region body
PF: predicated region fallthrough
CT: control target
= control target key end

     0   :  { %2 = vsyncpa [#allocation0], 0  ;;  %s61_s0 = inlined_call_operand.hbm [shape: c64[2,16,16], index: 0, kind: input, shape index: {}]   ;;  %s62_s1 = inlined_call_operand.vmem [shape: f32[2,16,16], index: 1, kind: output, shape index: {}]  }
   0x1   :  { %s3_s8 = sshll.u32 %s62_s1, 4  ;;  %s9_s11 = scalar_lea.hbm %s61_s0, 512  ;;  %s4_s8 = int_to_ptr.vmem [resolvable:$true] %s3_s8 }
   0x2   :  { %p10_p0 = scmp.ne.s32.totalorder %s61_s0, %s9_s11  ;;  %s11_s16 = scalar_lea.hbm %s61_s0, 1024 }
   0x3   :  { %p12_p1 = scmp.lt.u32.totalorder %s11_s16, %s9_s11  ;;  %p13_p2 = scmp.lt.u32.totalorder %s9_s11, %s61_s0 }
   0x5   :  { %p14_p3 = por %p13_p2, %p12_p1 }
   0x7   :  { %p15_p4 = pnand %p14_p3, %p10_p0 }
   0x9   :  { %18 = shalt.err (!%p15_p4)  }
   0xa   :  { %s19_s1 = scalar_lea.vmem %s4_s8, 512  ;;  %p24_p6 = scmp.lt.s32.totalorder %s4_s8, %s4_s8 }
   0xb   :  { %p20_p5 = scmp.ne.s32.totalorder %s4_s8, %s19_s1  ;;  %p25_p7 = scmp.lt.s32.totalorder %s19_s1, %s19_s1 }
   0xd   :  { %p26_p8 = por %p25_p7, %p24_p6 }
   0xf   :  { %p27_p9 = pnand %p26_p8, %p20_p5 }
  0x11   :  { %30 = shalt.err (!%p27_p9)  }
  0x12   :  { %6 = dma.hbm_to_vmem [thread:$0]  %s61_s0, 512, %s4_s8, [#allocation0] }
  0x13   :  { %31 = dma.done.wait [#allocation0], 512  }
  0x14   :  { %32 = vsyncadd [#allocation0], 4294966784 }
  0x15   :  { %8 = vsyncpa [#allocation0], 1 }

// kernel: xpdnet_block4_forward.2
= control target key start
LH: loop header
LB: loop body
LE: loop exit
PB: predicated region body
PF: predicated region fallthrough
CT: control target
= control target key end

     0   :  { %s1506_s0 = inlined_call_operand.vmem [shape: f32[36], index: 0, kind: input, shape index: {}]   ;;  %s1507_s1 = inlined_call_operand.vmem [shape: f32[2], index: 1, kind: input, shape index: {}]   ;;  %s1508_s2 = inlined_call_operand.<no memory space> [shape: f32[1], index: 2, kind: input, shape index: {}]   ;;  %s1509_s3 = inlined_call_operand.vmem [shape: f32[2,16,16], index: 3, kind: input, shape index: {}]   ;;  %s1510_s4 = inlined_call_operand.vmem [shape: f32[2,16,16], index: 4, kind: input, shape index: {}]   ;;  %s1511_s5 = inlined_call_operand.vmem [shape: f32[2,16,16], index: 5, kind: input, shape index: {}]   ;;  %s1512_s6 = inlined_call_operand.vmem [shape: f32[2,16,16], index: 6, kind: input, shape index: {}]   ;;  %s1513_s7 = inlined_call_operand.vmem [shape: f32[2,16,16], index: 7, kind: output, shape index: {0}]   ;;  %s1514_s8 = inlined_call_operand.vmem [shape: f32[2,16,16], index: 8, kind: output, shape index: {1}]  }
   0x1   :  { %1533 = sst [smem:[#allocation20_spill]] %s1506_s0 }
   0x2   :  { %1534 = sst [smem:[#allocation21_spill]] %s1507_s1 }
   0x3   :  { %1535 = sst [smem:[#allocation22_spill]] %s1509_s3 }
   0x4   :  { %1536 = sst [smem:[#allocation23_spill]] %s1510_s4 }
   0x5   :  { %1537 = sst [smem:[#allocation24_spill]] %s1511_s5 }
   0x6   :  { %1538 = sst [smem:[#allocation25_spill]] %s1512_s6 }
   0x7   :  { %1539 = sst [smem:[#allocation26_spill]] %s1513_s7 }
   0x8   :  { %1540 = sst [smem:[#allocation27_spill]] %s1514_s8 }
   0x9   :  { %14 = sst [smem:[#allocation3]] %s1508_s2 }
   0xa   :  { %15 = vsyncpa [#allocation5], 0 }
   0xb   :  { %16 = vsyncpa [#allocation7], 0  ;;  %s1072_s29 = smov 0  }
   0xc LB: > { %1541 = sst [smem:[#allocation10_spill]] %s1016_s29  ;;  %s1078_s30 = sadd.s32 4294967295, %s1016_s29   ;;  %s1016_s29 = sphi %s1072_s29, %s22_s29  }
   0xd   : > { %p876_p0 = scmp.ge.s32.totalorder %s1016_s29, 1  ;;  %p246_p1 = scmp.lt.s32.totalorder %s1016_s29, 3 }
   0xe   : > { %s1542_s0 = sld [smem:[#allocation20_spill]]  ;;  %p1515_p3 = scmp.eq.s32.totalorder %s1078_s30, 0 }
   0xf   : > { %p1085_p2 = pnand %p876_p0, %p246_p1  ;;  %s1544_s1 = sld [smem:[#allocation21_spill]] }
  0x11   : > { %s1543_s11 = scalar_select %p1085_p2, 1, 0 }
  0x12   : > { %p947_p4 = pneg %p1085_p2 }
  0x14   : > { %s259_s10 = sshll.u32 %s1542_s0, 4  ;;  %p1097_p5 = pnand %p1515_p3, %p947_p4  ;;  %s260_s10 = int_to_ptr.vmem [resolvable:$true] %s259_s10 }
  0x15   : > { %s270_s14 = sshll.u32 %s1544_s1, 4  ;;  %s972_s16 = scalar_lea.vmem %s260_s10, 16  ;;  %s271_s14 = int_to_ptr.vmem [resolvable:$true] %s270_s14 }
  0x16   : > { %p973_p6 = scmp.ne.s32.totalorder %s260_s10, %s972_s16  ;;  %p974_p7 = pneg %p1097_p5 }
  0x17   : > { %p980_p10 = scmp.lt.s32.totalorder %s260_s10, %s260_s10  ;;  %p981_p11 = scmp.lt.s32.totalorder %s972_s16, %s972_s16 }
  0x18   : > { %p975_p8 = pnand %p974_p7, %p973_p6 }
  0x19   : > { %p982_p12 = por %p981_p11, %p980_p10 }
  0x1a   : > { %p976_p9 = pneg %p975_p8 }
  0x1c   : > { %p983_p13 = pnand %p982_p12, %p976_p9 }
  0x1e   : > { %986 = shalt.err (!%p983_p13)
}
  0x1f   : > { %s1018_s17 = smov [#allocation4]   ;;  %s987_s18 = scalar_lea.vmem %s271_s14, 16 }
  0x20   : > { %950 = dma.vmem_to_smem (!%p1097_p5), %s260_s10, 16, %s1018_s17, [#allocation5]  }
  0x21   : > { %p988_p0 = scmp.ne.s32.totalorder %s271_s14, %s987_s18  ;;  %p995_p3 = scmp.lt.s32.totalorder %s271_s14, %s271_s14 }
  0x22   : > { %p996_p2 = scmp.lt.s32.totalorder %s987_s18, %s987_s18 }
  0x23   : > { %p990_p1 = pnand %p988_p0, %p974_p7 }
  0x24   : > { %p997_p6 = por %p996_p2, %p995_p3 }
  0x25   : > { %p991_p4 = pneg %p990_p1 }
  0x27   : > { %p998_p8 = pnand %p997_p6, %p991_p4 }
  0x29   : > { %1001 = shalt.err (!%p998_p8)
}
  0x2a   : > { %s1019_s19 = smov [#allocation6]   ;;  %p1546_p9 = scmp.ne.s32.totalorder %s1543_s11, 0 }
  0x2b   : > { %953 = dma.vmem_to_smem (!%p1097_p5), %s271_s14, 16, %s1019_s19, [#allocation7]  }
  0x2c   : > { %318 = sbr.rel (%p1546_p9) target bundleno = 353 (0x161), region = 48 }
  0x33   : > { %p1547_p10 = scmp.eq.s32.totalorder %s1078_s30, 0 }
  0x35   : > { %1007 = dma.done.wait (%p1547_p10), [#allocation5], 16   ;;  %p1548_p11 = pmov %p1547_p10 }
  0x36   : > { %p1549_p7 = pmov %p1547_p10 }
  0x37   : > { %1009 = vsyncadd (%p1548_p11), [#allocation5], 4294967280 }
  0x38   : > { %1011 = dma.done.wait (%p1549_p7), [#allocation7], 16   ;;  %p1550_p2 = pmov %p1549_p7 }
  0x3a   : > { %1013 = vsyncadd (%p1550_p2), [#allocation7], 4294967280 }
  0x3b   : > { %328 = sfence }
  0x3c   : > { %p377_p3 = scmp.lt.s32.totalorder %s1078_s30, 1  ;;  %vm407_vm0 = vcmask 146432   ;;  %vm410_vm1 = vcmask 140288   ;;  %v1020_v0 = vmov 0.0   ;;  %s1552_s3 = sld [smem:[#allocation22_spill]]  ;;  %vm463_vm2 = vcmask 138248  }
  0x3d   : > { %408 = vst.msk [vmem:[#allocation2] sm:$0xff] %vm407_vm0, %v1020_v0  ;;  %409 = vst.msk [vmem:[#allocation2 + $0x8] sm:$0xff] %vm407_vm0, %v1020_v0  ;;  %s1553_s4 = sld [smem:[#allocation23_spill]]  ;;  %s1021_s27 = smov 1   ;;  %vm715_vm3 = vcmask 130048  }
  0x3e   : > { %411 = vst.msk [vmem:[#allocation2 + $0x10] sm:$0x3] %vm410_vm1, %v1020_v0  ;;  %s1577_s30 = smov (!%p377_p3, %s1078_s30), 1  ;;  %s1141_s28 = sld [smem:[#allocation4 + $0x1]] }
  0x3f   : > { %s1119_s20 = sshll.u32 %s1577_s30, 4  ;;  %s1143_s30 = sld [smem:[#allocation4 + $0x4]] }
  0x40   : > { %1551 = sst [smem:[#allocation11_spill]] %s1119_s20  ;;  %s1145_s9 = sld [smem:[#allocation4 + $0x7]] }
  0x41   : > { %s1147_s2 = sld [smem:[#allocation4 + $0x13]]  ;;  %s1149_s10 = sld [smem:[#allocation4 + $0x16]] }
  0x42   : > { %s381_s23 = scalar_lea.vmem %s1552_s3, %s1119_s20  ;;  %s1151_s11 = sld [smem:[#allocation4 + $0x19]] }
  0x43   : > { %s386_s26 = scalar_lea.vmem %s1553_s4, %s1119_s20  ;;  %v1129_v1 = vld [vmem:[%s381_s23] sm:$0xff]  ;;  %v1135_v3 = vld [vmem:[%s381_s23 + $0x8] sm:$0xff]  ;;  %s1153_s12 = sld [smem:[#allocation4 + $0xa]] }
  0x44   : > { %v1131_v2 = vld [vmem:[%s386_s26] sm:$0xff]  ;;  %457 = vrot.lane.b32.xlu0 %v1129_v1, %s1021_s27  ;;  %v1137_v4 = vld [vmem:[%s386_s26 + $0x8] sm:$0xff]  ;;  %s1155_s13 = sld [smem:[#allocation4 + $0xd]]  ;;  %s1157_s14 = sld [smem:[#allocation4 + $0x10]]  ;;  %v498_v6 = vstv %s1141_s28 }
  0x45   : > { %552 = vrot.lane.b32.xlu1 %v1131_v2, %s1021_s27  ;;  %s1159_s15 = sld [smem:[#allocation4 + $0x2]]  ;;  %s1161_s16 = sld [smem:[#allocation4 + $0x1c]]  ;;  %v504_v7 = vstv %s1143_s30 }
  0x46   : > { %s1163_s17 = sld [smem:[#allocation4 + $0x1f]]  ;;  %s1165_s18 = sld [smem:[#allocation4 + $0x22]]  ;;  %v514_v8 = vstv %s1145_s9 }
  0x47   : > { %s1167_s19 = sld [smem:[#allocation4 + $0x5]]  ;;  %s1169_s21 = sld [smem:[#allocation4 + $0x8]]  ;;  %v501_v9 = vstv %s1147_s2  ;;  %v507_v12 = vstv %s1149_s10 }
  0x48   : > { %459 = vrot.lane.b32.xlu0 %v1135_v3, %s1021_s27  ;;  %1554 = sst [smem:[#allocation12_spill]] %s1151_s11  ;;  %s1171_s22 = sld [smem:[#allocation4 + $0xb]]  ;;  %v517_v13 = vstv %s1151_s11 }
  0x49   : > { %554 = vrot.lane.b32.xlu1 %v1137_v4, %s1021_s27  ;;  %1555 = sst [smem:[#allocation13_spill]] %s1153_s12  ;;  %s1173_s23 = sld [smem:[#allocation4 + $0xe]]  ;;  %v596_v10 = vstv %s1153_s12 }
  0x4a   : > { %1556 = sst [smem:[#allocation14_spill]] %s1155_s13  ;;  %s1175_s24 = sld [smem:[#allocation4 + $0x11]]  ;;  %v606_v11 = vstv %s1155_s13  ;;  %v616_v14 = vstv %s1157_s14 }
  0x4b   : > { %1557 = sst [smem:[#allocation15_spill]] %s1157_s14  ;;  %s1177_s25 = sld [smem:[#allocation4 + $0x14]]  ;;  %v599_v15 = vstv %s1161_s16  ;;  %v524_v17 = vstv %s1159_s15 }
  0x4c   : > { %1558 = sst [smem:[#allocation16_spill]] %s1163_s17  ;;  %s1179_s26 = sld [smem:[#allocation4 + $0x17]]  ;;  %v609_v16 = vstv %s1163_s17  ;;  %v619_v19 = vstv %s1165_s18 }
  0x4d   : > { %s1181_s27 = sld [smem:[#allocation4 + $0x1a]]  ;;  %s1183_s0 = sld [smem:[#allocation4 + $0x1d]]  ;;  %v530_v20 = vstv %s1167_s19  ;;  %v540_v21 = vstv %s1169_s21 }
  0x4e   : > { %s1185_s1 = sld [smem:[#allocation4 + $0x20]]  ;;  %s1187_s3 = sld [smem:[#allocation4 + $0x23]]  ;;  %v626_v22 = vstv %s1171_s22 }
  0x4f   : > { %s1189_s4 = sld [smem:[#allocation4]]  ;;  %s1191_s29 = sld [smem:[#allocation4 + $0x3]]  ;;  %v636_v24 = vstv %s1173_s23 }
  0x50   : > { %s1193_s8 = sld [smem:[#allocation4 + $0x6]]  ;;  %s1195_s7 = sld [smem:[#allocation4 + $0x12]]  ;;  %v646_v25 = vstv %s1175_s24 }
  0x51   : > { %s1197_s6 = sld [smem:[#allocation6]]  ;;  %s1199_s5 = sld [smem:[#allocation4 + $0x15]]  ;;  %v527_v26 = vstv %s1177_s25 }
  0x52   : > { %s1201_s20 = sld [smem:[#allocation6 + $0x1]]  ;;  %s1222_s12 = sld [smem:[#allocation4 + $0xf]]  ;;  %v533_v27 = vstv %s1179_s26 }
  0x53   : > { %s1224_s13 = sld [smem:[#allocation4 + $0x1b]]  ;;  %v543_v28 = vstv %s1181_s27  ;;  %v629_v29 = vstv %s1183_s0  ;;  %s1415_s10 = sld [smem:[#allocation4 + $0x21]] }
  0x54   : > { %v639_v30 = vstv %s1185_s1  ;;  %v649_v31 = vstv %s1187_s3  ;;  %s1023_s0 = smov 126   ;;  %s1570_s1 = sld [smem:[#allocation11_spill]] }
  0x55   : > { %1559 = sst [smem:[#allocation17_spill]] %s1189_s4  ;;  %s1203_s4 = sld [smem:[#allocation4 + $0x9]]  ;;  %v476_v33 = vstv %s1191_s29 }
  0x56   : > { %s1562_s11 = sld [smem:[#allocation17_spill]]  ;;  %v488_v34 = vstv %s1193_s8  ;;  %v471_v35 = vstv %s1195_s7  ;;  %s1398_s8 = sld [smem:[#allocation4 + $0x1e]] }
  0x57   : > { %1560 = sst [smem:[#allocation18_spill]] %s1199_s5  ;;  %s1214_s5 = sld [smem:[#allocation4 + $0xc]]  ;;  %v666_v38 = vstv %s1197_s6 }
  0x58   : > { %1561 = sst [smem:[#allocation19_spill]] %s1201_s20  ;;  %s1216_s20 = sld [smem:[#allocation4 + $0x18]]  ;;  %v586_v52 = vstv %s1222_s12 }
  0x59   : > { %s1563_s14 = sld [smem:[#allocation19_spill]]  ;;  %s1564_s17 = sld [smem:[#allocation18_spill]]  ;;  %v565_v54 = vstv %s1224_s13 }
  0x5a   : > { %s1022_s29 = smov 127   ;;  %s450_s3 = sld [smem:[#allocation3]] }
  0x5b   : > { %v562_v40 = vstv %s1203_s4  ;;  %s1571_s6 = sld [smem:[#allocation24_spill]]  ;;  %s1572_s12 = sld [smem:[#allocation25_spill]] }
  0x5c   : > { %v468_v32 = vstv %s1562_s11  ;;  %s1573_s16 = sld [smem:[#allocation26_spill]]  ;;  %s1574_s22 = sld [smem:[#allocation27_spill]] }
  0x5d   : > { %v574_v51 = vstv %s1214_s5 }
  0x5e   : > { %v491_v53 = vstv %s1216_s20 }
  0x5f   : > { %v689_v39 = vstv %s1563_s14  ;;  %v479_v41 = vstv %s1564_s17 }
  0x61   : > { %s391_s7 = scalar_lea.vmem %s1571_s6, %s1570_s1  ;;  %s396_s13 = scalar_lea.vmem %s1572_s12, %s1570_s1 }
  0x62   : > { %s401_s17 = scalar_lea.vmem %s1573_s16, %s1570_s1  ;;  %s406_s23 = scalar_lea.vmem %s1574_s22, %s1570_s1 }
  0xb6   : > { %v458_v5 = vpop.permute.xlu0 %457 }
  0xb7   : > { %464 = vst.msk [vmem:[#allocation2 + $0x1] sm:$0xff] %vm463_vm2, %v458_v5  ;;  %v553_v23 = vpop.permute.xlu1 %552 }
  0xba   : > { %v460_v18 = vpop.permute.xlu0 %459 }
  0xbb   : > { %465 = vst.msk [vmem:[#allocation2 + $0x9] sm:$0xff] %vm463_vm2, %v460_v18  ;;  %v555_v50 = vpop.permute.xlu1 %554 }
  0xbe   : > { %v466_v36 = vld [vmem:[#allocation2] sm:$0xff] }
  0xbf   : > { %v474_v37 = vld [vmem:[#allocation2 + $0x1] sm:$0xff]  ;;  %v499_v42 = vmul.f32 %v498_v6, %v466_v36  ;;  %v502_v44 = vmul.f32 %v501_v9, %v466_v36  ;;  %v525_v46 = vmul.f32 %v524_v17, %v466_v36  ;;  %v528_v48 = vmul.f32 %v527_v26, %v466_v36 }
  0xc0   : > { %v505_v43 = vmul.f32 %v504_v7, %v474_v37  ;;  %v508_v45 = vmul.f32 %v507_v12, %v474_v37  ;;  %v531_v47 = vmul.f32 %v530_v20, %v474_v37  ;;  %v534_v49 = vmul.f32 %v533_v27, %v474_v37 }
  0xc1   : > { %v469_v60 = vmul.f32 %v468_v32, %v466_v36  ;;  %v477_v61 = vmul.f32 %v476_v33, %v474_v37 }
  0xc2   : > { %v1261_v55 = vld [vmem:[#allocation2 + $0x8] sm:$0xff]  ;;  %v510_v58 = vadd.f32 %v505_v43, %v499_v42  ;;  %v512_v59 = vadd.f32 %v508_v45, %v502_v44  ;;  %v536_v18 = vadd.f32 %v531_v47, %v525_v46  ;;  %v538_v44 = vadd.f32 %v534_v49, %v528_v48 }
  0xc3   : > { %v1263_v56 = vld [vmem:[#allocation2 + $0x2] sm:$0xff]  ;;  %v1272_v62 = vld [vmem:[#allocation2 + $0xa] sm:$0xff]  ;;  %v500_v0 = vmul.f32 %v498_v6, %v1261_v55  ;;  %v503_v42 = vmul.f32 %v501_v9, %v1261_v55  ;;  %v1298_v45 = vmul.f32 %v471_v35, %v466_v36  ;;  %v1302_v46 = vmul.f32 %v479_v41, %v474_v37 }
  0xc4   : > { %v1265_v57 = vld [vmem:[#allocation2 + $0x9] sm:$0xff]  ;;  %558 = vst.msk [vmem:[#allocation2 + $0x1] sm:$0xff] %vm463_vm2, %v553_v23  ;;  %v515_v63 = vmul.f32 %v514_v8, %v1263_v56  ;;  %v518_v23 = vmul.f32 %v517_v13, %v1263_v56  ;;  %v516_v47 = vmul.f32 %v514_v8, %v1272_v62  ;;  %v526_v9 = vmul.f32 %v524_v17, %v1261_v55 }
  0xc5   : > { %v506_v5 = vmul.f32 %v504_v7, %v1265_v57  ;;  %559 = vst.msk [vmem:[#allocation2 + $0x9] sm:$0xff] %vm463_vm2, %v555_v50  ;;  %v509_v43 = vmul.f32 %v507_v12, %v1265_v57  ;;  %v541_v7 = vmul.f32 %v540_v21, %v1263_v56  ;;  %v532_v12 = vmul.f32 %v530_v20, %v1265_v57 }
  0xc6   : > { %v520_v48 = vadd.f32 %v515_v63, %v510_v58  ;;  %v519_v49 = vmul.f32 %v517_v13, %v1272_v62  ;;  %v544_v36 = vmul.f32 %v543_v28, %v1263_v56  ;;  %v529_v37 = vmul.f32 %v527_v26, %v1261_v55 }
  0xc7   : > { %v511_v6 = vadd.f32 %v506_v5, %v500_v0  ;;  %v513_v50 = vadd.f32 %v509_v43, %v503_v42  ;;  %v522_v8 = vadd.f32 %v518_v23, %v512_v59  ;;  %v537_v0 = vadd.f32 %v532_v12, %v526_v9 }
  0xc8   : > { %v542_v17 = vmul.f32 %v540_v21, %v1272_v62  ;;  %v535_v20 = vmul.f32 %v533_v27, %v1265_v57  ;;  %v546_v5 = vadd.f32 %v541_v7, %v536_v18  ;;  %v482_v13 = vadd.f32 %v477_v61, %v469_v60 }
  0xc9   : > { %v521_v58 = vadd.f32 %v516_v47, %v511_v6  ;;  %v523_v63 = vadd.f32 %v519_v49, %v513_v50  ;;  %v548_v26 = vadd.f32 %v544_v36, %v538_v44  ;;  %v545_v59 = vmul.f32 %v543_v28, %v1272_v62 }
  0xca   : > { %v489_v21 = vmul.f32 %v488_v34, %v1263_v56  ;;  %v1335_v27 = vmul.f32 %v476_v33, %v1265_v57  ;;  %v547_v44 = vadd.f32 %v542_v17, %v537_v0  ;;  %v539_v33 = vadd.f32 %v535_v20, %v529_v37 }
  0xcb   : > { %v1322_v42 = vld [vmem:[#allocation2] sm:$0xff]  ;;  %v1360_v50 = vmul.f32 %v488_v34, %v1272_v62  ;;  %v470_v9 = vmul.f32 %v468_v32, %v1261_v55 }
  0xcc   : > { %v1324_v43 = vld [vmem:[#allocation2 + $0x1] sm:$0xff]  ;;  %v597_v61 = vmul.f32 %v596_v10, %v1322_v42  ;;  %v1344_v23 = vld [vmem:[#allocation2 + $0x9] sm:$0xff]  ;;  %v600_v28 = vmul.f32 %v599_v15, %v1322_v42  ;;  %v627_v32 = vmul.f32 %v626_v22, %v1322_v42 }
  0xcd   : > { %v1337_v60 = vld [vmem:[#allocation2 + $0x2] sm:$0xff]  ;;  %v607_v6 = vmul.f32 %v606_v11, %v1324_v43  ;;  %v1352_v7 = vld [vmem:[#allocation2 + $0xa] sm:$0xff]  ;;  %v610_v36 = vmul.f32 %v609_v16, %v1324_v43  ;;  %v608_v34 = vmul.f32 %v606_v11, %v1344_v23  ;;  %v637_v11 = vmul.f32 %v636_v24, %v1324_v43 }
  0xce   : > { %v1342_v18 = vld [vmem:[#allocation2 + $0x8] sm:$0xff]  ;;  %v602_v12 = vadd.f32 %v597_v61, %v520_v48  ;;  %v604_v49 = vadd.f32 %v600_v28, %v522_v8  ;;  %v618_v8 = vmul.f32 %v616_v14, %v1352_v7  ;;  %v632_v61 = vadd.f32 %v627_v32, %v546_v5 }
  0xcf   : > { %v598_v47 = vmul.f32 %v596_v10, %v1342_v18  ;;  %v601_v37 = vmul.f32 %v599_v15, %v1342_v18  ;;  %v617_v10 = vmul.f32 %v616_v14, %v1337_v60  ;;  %v611_v15 = vmul.f32 %v609_v16, %v1344_v23 }
  0xd0   : > { %v612_v48 = vadd.f32 %v607_v6, %v602_v12  ;;  %v614_v6 = vadd.f32 %v610_v36, %v604_v49  ;;  %v647_v14 = vmul.f32 %v646_v25, %v1337_v60  ;;  %v638_v5 = vmul.f32 %v636_v24, %v1344_v23 }
  0xd1   : > { %v603_v0 = vadd.f32 %v598_v47, %v521_v58  ;;  %v605_v17 = vadd.f32 %v601_v37, %v523_v63  ;;  %v628_v58 = vmul.f32 %v626_v22, %v1342_v18  ;;  %v642_v63 = vadd.f32 %v637_v11, %v632_v61 }
  0xd2   : > { %v622_v28 = vadd.f32 %v617_v10, %v612_v48  ;;  %v620_v22 = vmul.f32 %v619_v19, %v1337_v60  ;;  %v621_v49 = vmul.f32 %v619_v19, %v1352_v7  ;;  %v648_v36 = vmul.f32 %v646_v25, %v1352_v7 }
  0xd3   : > { %v613_v20 = vadd.f32 %v608_v34, %v603_v0  ;;  %v615_v47 = vadd.f32 %v611_v15, %v605_v17  ;;  %v633_v12 = vadd.f32 %v628_v58, %v547_v44  ;;  %v630_v44 = vmul.f32 %v629_v29, %v1322_v42 }
  0xd4   : > { %658 = vrot.lane.b32.xlu0 %v622_v28, %s1022_s29  ;;  %v652_v24 = vadd.f32 %v647_v14, %v642_v63  ;;  %v549_v10 = vadd.f32 %v545_v59, %v539_v33  ;;  %v631_v0 = vmul.f32 %v629_v29, %v1342_v18  ;;  %v624_v19 = vadd.f32 %v620_v22, %v614_v6 }
  0xd5   : > { %v623_v16 = vadd.f32 %v618_v8, %v613_v20  ;;  %v643_v37 = vadd.f32 %v638_v5, %v633_v12  ;;  %v634_v34 = vadd.f32 %v630_v44, %v548_v26  ;;  %v640_v25 = vmul.f32 %v639_v30, %v1324_v43 }
  0xd6   : > { %v494_v32 = vadd.f32 %v489_v21, %v482_v13  ;;  %v625_v48 = vadd.f32 %v621_v49, %v615_v47  ;;  %v635_v17 = vadd.f32 %v631_v0, %v549_v10  ;;  %v641_v59 = vmul.f32 %v639_v30, %v1344_v23 }
  0xd7   : > { %660 = vrot.lane.b32.xlu1 %v623_v16, %s1022_s29  ;;  %v653_v8 = vadd.f32 %v648_v36, %v643_v37  ;;  %v644_v29 = vadd.f32 %v640_v25, %v634_v34  ;;  %v650_v33 = vmul.f32 %v649_v31, %v1337_v60  ;;  %v651_v26 = vmul.f32 %v649_v31, %v1352_v7 }
  0xd8   : > { %681 = vrot.lane.b32.xlu0 %v624_v19, %s1022_s29  ;;  %v563_v13 = vmul.f32 %v562_v40, %v1322_v42  ;;  %v667_v21 = vadd.f32 %v666_v38, %v652_v24  ;;  %v645_v15 = vadd.f32 %v641_v59, %v635_v17  ;;  %v575_v30 = vmul.f32 %v574_v51, %v1324_v43  ;;  %v707_v59 = vld [vmem:[%s391_s7 + $0x8] sm:$0xff] }
  0xd9   : > { %v564_v20 = vmul.f32 %v562_v40, %v1342_v18  ;;  %v654_v61 = vadd.f32 %v650_v33, %v644_v29  ;;  %v483_v31 = vadd.f32 %v1335_v27, %v470_v9  ;;  %v484_v58 = vadd.f32 %v1302_v46, %v1298_v45 }
  0xda   : > { %v568_v11 = vadd.f32 %v563_v13, %v494_v32  ;;  %v668_v28 = vadd.f32 %v666_v38, %v653_v8  ;;  %v655_v6 = vadd.f32 %v651_v26, %v645_v15  ;;  %v492_v47 = vmul.f32 %v491_v53, %v1263_v56 }
  0xdb   : > { %683 = vrot.lane.b32.xlu1 %v625_v48, %s1022_s29  ;;  %v577_v14 = vstv %s1398_s8  ;;  %v587_v40 = vmul.f32 %v586_v52, %v1337_v60  ;;  %v495_v9 = vadd.f32 %v1360_v50, %v483_v31  ;;  %v566_v38 = vmul.f32 %v565_v54, %v1322_v42  ;;  %v706_v48 = vld [vmem:[%s391_s7] sm:$0xff] }
  0xdc   : > { %671 = vrot.lane.b32.xlu0 %v667_v21, %s1023_s0  ;;  %v580_v27 = vadd.f32 %v575_v30, %v568_v11  ;;  %v496_v45 = vadd.f32 %v492_v47, %v484_v58  ;;  %v589_v46 = vstv %s1415_s10  ;;  %v481_v56 = vmul.f32 %v479_v41, %v1265_v57  ;;  %v719_v58 = vld [vmem:[%s396_s13 + $0x8] sm:$0xff] }
  0xdd   : > { %v690_v16 = vadd.f32 %v689_v39, %v654_v61  ;;  %v576_v12 = vmul.f32 %v574_v51, %v1344_v23  ;;  %v569_v5 = vadd.f32 %v564_v20, %v495_v9  ;;  %v691_v50 = vadd.f32 %v689_v39, %v655_v6  ;;  %v718_v61 = vld [vmem:[%s396_s13] sm:$0xff] }
  0xde   : > { %v592_v63 = vadd.f32 %v587_v40, %v580_v27  ;;  %v578_v22 = vmul.f32 %v577_v14, %v1324_v43  ;;  %v570_v42 = vadd.f32 %v566_v38, %v496_v45  ;;  %v473_v49 = vmul.f32 %v471_v35, %v1261_v55 }
  0xdf   : > { %673 = vrot.lane.b32.xlu1 %v668_v28, %s1023_s0  ;;  %v588_v41 = vmul.f32 %v586_v52, %v1352_v7  ;;  %v581_v57 = vadd.f32 %v576_v12, %v569_v5  ;;  %v590_v36 = vmul.f32 %v589_v46, %v1337_v60  ;;  %v493_v51 = vmul.f32 %v491_v53, %v1272_v62 }
  0xe0   : > { %694 = vrot.lane.b32.xlu0 %v690_v16, %s1023_s0  ;;  %v582_v44 = vadd.f32 %v578_v22, %v570_v42  ;;  %v567_v39 = vmul.f32 %v565_v54, %v1342_v18  ;;  %v485_v43 = vadd.f32 %v481_v56, %v473_v49  ;;  %v579_v55 = vmul.f32 %v577_v14, %v1344_v23 }
  0xe1   : > { %v593_v24 = vadd.f32 %v588_v41, %v581_v57  ;;  %v591_v52 = vmul.f32 %v589_v46, %v1352_v7  ;;  %v710_v33 = vstv %s450_s3 }
  0xe2   : > { %v594_v37 = vadd.f32 %v590_v36, %v582_v44  ;;  %v497_v35 = vadd.f32 %v493_v51, %v485_v43 }
  0xe3   : > { %696 = vrot.lane.b32.xlu1 %v691_v50, %s1023_s0 }
  0xe4   : > { %v571_v10 = vadd.f32 %v567_v39, %v497_v35 }
  0xe6   : > { %v583_v0 = vadd.f32 %v579_v55, %v571_v10 }
  0xe8   : > { %v595_v60 = vadd.f32 %v591_v52, %v583_v0 }
 0x146   : > { %v659_v19 = vpop.permute.xlu0 %658 }
 0x147   : > { %v664_v62 = vadd.f32 %v659_v19, %v592_v63 }
 0x149   : > { %v661_v34 = vpop.permute.xlu1 %660 }
 0x14a   : > { %v682_v25 = vpop.permute.xlu0 %681  ;;  %v665_v54 = vadd.f32 %v661_v34, %v593_v24 }
 0x14b   : > { %v687_v7 = vadd.f32 %v682_v25, %v594_v37 }
 0x14d   : > { %v684_v53 = vpop.permute.xlu1 %683 }
 0x14e   : > { %v672_v18 = vpop.permute.xlu0 %671  ;;  %v688_v29 = vadd.f32 %v684_v53, %v595_v60 }
 0x14f   : > { %v677_v32 = vadd.f32 %v672_v18, %v664_v62 }
 0x151   : > { %v674_v23 = vpop.permute.xlu1 %673  ;;  %v702_v17 = vadd.f32 %v677_v32, %v1129_v1 }
 0x152   : > { %v678_v8 = vadd.f32 %v674_v23, %v665_v54  ;;  %v695_v13 = vpop.permute.xlu0 %694 }
 0x153   : > { %v708_v21 = vsub.f32 %v702_v17, %v706_v48  ;;  %v700_v15 = vadd.f32 %v695_v13, %v687_v7 }
 0x154   : > { %v703_v26 = vadd.f32 %v678_v8, %v1135_v3 }
 0x155   : > { %v697_v30 = vpop.permute.xlu1 %696  ;;  %v711_v31 = vmul.f32 %v710_v33, %v708_v21  ;;  %v704_v1 = vadd.f32 %v700_v15, %v1131_v2 }
 0x156   : > { %v709_v20 = vsub.f32 %v703_v26, %v707_v59  ;;  %v701_v11 = vadd.f32 %v697_v30, %v688_v29 }
 0x157   : > { %v713_v6 = vsub.f32 %v702_v17, %v711_v31  ;;  %v720_v47 = vsub.f32 %v704_v1, %v718_v61 }
 0x158   : > { %v712_v28 = vmul.f32 %v710_v33, %v709_v20  ;;  %v705_v3 = vadd.f32 %v701_v11, %v1137_v4 }
 0x159   : > { %716 = vst.msk [vmem:[%s401_s17] sm:$0xff] %vm715_vm3, %v713_v6  ;;  %v722_v27 = vmul.f32 %v720_v47, %v710_v33 }
 0x15a   : > { %v714_v14 = vsub.f32 %v703_v26, %v712_v28  ;;  %v721_v40 = vsub.f32 %v705_v3, %v719_v58 }
 0x15b   : > { %v724_v9 = vsub.f32 %v704_v1, %v722_v27 }
 0x15c   : > { %717 = vst.msk [vmem:[%s401_s17 + $0x8] sm:$0xff] %vm715_vm3, %v714_v14  ;;  %v723_v2 = vmul.f32 %v721_v40, %v710_v33 }
 0x15d   : > { %726 = vst.msk [vmem:[%s406_s23] sm:$0xff] %vm715_vm3, %v724_v9 }
 0x15e   : > { %v725_v38 = vsub.f32 %v705_v3, %v723_v2 }
 0x160   : > { %727 = vst.msk [vmem:[%s406_s23 + $0x8] sm:$0xff] %vm715_vm3, %v725_v38 }
 0x161 PF: > { %s1575_s24 = sld [smem:[#allocation10_spill]] }
 0x167   : > { %s22_s29 = sadd.s32 1, %s1575_s24  }
 0x168   : > { %p19_p5 = scmp.ge.s32.totalorder %s22_s29, 4  }
 0x16a   :  { %21 = sbr.rel (!%p19_p5) target bundleno = 12 (0xc), region = 108 }
 0x171   :  { %765 = vsyncpa [#allocation5], 1 }
 0x172   :  { %767 = vsyncpa [#allocation5 + $0x1], 1 }
 0x173   :  { %768 = vsyncpa [#allocation7], 1 }

// kernel: xpdnet_block4_forward.3
= control target key start
LH: loop header
LB: loop body
LE: loop exit
PB: predicated region body
PF: predicated region fallthrough
CT: control target
= control target key end

     0   :  { %s1789_s0 = inlined_call_operand.vmem [shape: f32[18], index: 0, kind: input, shape index: {}]   ;;  %s1790_s1 = inlined_call_operand.<no memory space> [shape: f32[1], index: 1, kind: input, shape index: {}]   ;;  %s1791_s2 = inlined_call_operand.vmem [shape: f32[2,8,8], index: 2, kind: input, shape index: {}]   ;;  %s1792_s3 = inlined_call_operand.vmem [shape: f32[2,8,8], index: 3, kind: input, shape index: {}]   ;;  %s1793_s4 = inlined_call_operand.vmem [shape: f32[2,8,8], index: 4, kind: input, shape index: {}]   ;;  %s1794_s5 = inlined_call_operand.vmem [shape: f32[2,8,8], index: 5, kind: input, shape index: {}]   ;;  %s1795_s6 = inlined_call_operand.vmem [shape: f32[2,8,8], index: 6, kind: input, shape index: {}]   ;;  %s1796_s7 = inlined_call_operand.vmem [shape: f32[2,8,8], index: 7, kind: input, shape index: {}]   ;;  %s1797_s8 = inlined_call_operand.vmem [shape: f32[2,8,8], index: 8, kind: input, shape index: {}]   ;;  %s1798_s9 = inlined_call_operand.vmem [shape: f32[2,8,8], index: 9, kind: input, shape index: {}]   ;;  %s1799_s10 = inlined_call_operand.vmem [shape: f32[2,8,8], index: 10, kind: input, shape index: {}]   ;;  %s1800_s11 = inlined_call_operand.vmem [shape: f32[2,8,8], index: 11, kind: input, shape index: {}]   ;;  %s1801_s12 = inlined_call_operand.vmem [shape: f32[2,8,8], index: 12, kind: input, shape index: {}]   ;;  %s1802_s13 = inlined_call_operand.vmem [shape: f32[2,8,8], index: 13, kind: input, shape index: {}]   ;;  %s1803_s14 = inlined_call_operand.vmem [shape: f32[2,8,8], index: 14, kind: input, shape index: {}]   ;;  %s1804_s15 = inlined_call_operand.vmem [shape: f32[2,8,8], index: 15, kind: input, shape index: {}]   ;;  %s1805_s16 = inlined_call_operand.vmem [shape: f32[2,8,8], index: 16, kind: input, shape index: {}]   ;;  %s1806_s17 = inlined_call_operand.vmem [shape: f32[2,8,8], index: 17, kind: input, shape index: {}]   ;;  %s1807_s18 = inlined_call_operand.vmem [shape: f32[2,1,16,8], index: 18, kind: output, shape index: {}]  }
   0x1   :  { %1808 = sst [smem:[#allocation7_spill]] %s1789_s0 }
   0x2   :  { %1809 = sst [smem:[#allocation8_spill]] %s1790_s1 }
   0x3   :  { %1810 = sst [smem:[#allocation9_spill]] %s1791_s2  ;;  %s1812_s29 = sld [smem:[#allocation8_spill]] }
   0x4   :  { %1811 = sst [smem:[#allocation10_spill]] %s1792_s3 }
   0x9   :  { %23 = sst [smem:[#allocation3]] %s1812_s29 }
   0xa   :  { %24 = vsyncpa [#allocation5], 0  ;;  %s1583_s30 = smov 0  }
   0xb LB: > { %s1589_s0 = sadd.s32 4294967295, %s1479_s30   ;;  %p1389_p0 = scmp.ge.s32.totalorder %s1479_s30, 1  ;;  %s1479_s30 = sphi %s1583_s30, %s30_s30  }
   0xc   : > { %p519_p1 = scmp.lt.s32.totalorder %s1479_s30, 3  ;;  %s1813_s20 = sld [smem:[#allocation7_spill]] }
   0xd   : > { %p1440_p3 = scmp.eq.s32.totalorder %s1589_s0, 0 }
   0xe   : > { %p1596_p2 = pnand %p1389_p0, %p519_p1 }
  0x10   : > { %p1436_p4 = pneg %p1596_p2 }
  0x12   : > { %s532_s21 = sshll.u32 %s1813_s20, 4  ;;  %p1437_p5 = pnand %p1440_p3, %p1436_p4  ;;  %s533_s21 = int_to_ptr.vmem [resolvable:$true] %s532_s21 }
  0x13   : > { %s1454_s2 = scalar_lea.vmem %s533_s21, 16  ;;  %p1462_p10 = scmp.lt.s32.totalorder %s533_s21, %s533_s21 }
  0x14   : > { %p1455_p6 = scmp.ne.s32.totalorder %s533_s21, %s1454_s2  ;;  %p1456_p7 = pneg %p1437_p5 }
  0x15   : > { %p1463_p11 = scmp.lt.s32.totalorder %s1454_s2, %s1454_s2 }
  0x16   : > { %p1457_p8 = pnand %p1456_p7, %p1455_p6 }
  0x17   : > { %p1464_p12 = por %p1463_p11, %p1462_p10 }
  0x18   : > { %p1458_p9 = pneg %p1457_p8 }
  0x1a   : > { %p1465_p13 = pnand %p1464_p12, %p1458_p9 }
  0x1c   : > { %1468 = shalt.err (!%p1465_p13)
}
  0x1d   : > { %s1481_s23 = smov [#allocation4]   ;;  %660 = sbr.rel (%p1596_p2) target bundleno = 486 (0x1e6), region = 92 }
  0x1e   : > { %1439 = dma.vmem_to_smem (!%p1437_p5), %s533_s21, 16, %s1481_s23, [#allocation5]  }
  0x24   : > { %1474 = dma.done.wait (%p1440_p3), [#allocation5], 16  }
  0x25   : > { %1476 = vsyncadd (%p1440_p3), [#allocation5], 4294967280 }
  0x26   : > { %666 = sfence }
  0x27   : > { %p774_p0 = scmp.lt.s32.totalorder %s1589_s0, 1  ;;  %vm843_vm0 = vcmask 72704   ;;  %vm846_vm1 = vcmask 65536   ;;  %v1482_v0 = vmov 0.0   ;;  %s1815_s27 = sld [smem:[#allocation9_spill]]  ;;  %vm872_vm2 = vcmask 72712  }
  0x28   : > { %844 = vst.msk [vmem:[#allocation2] sm:$0xff] %vm843_vm0, %v1482_v0  ;;  %845 = vst.msk [vmem:[#allocation2 + $0x8] sm:$0xff] %vm843_vm0, %v1482_v0  ;;  %s1816_s3 = sld [smem:[#allocation10_spill]]  ;;  %s1483_s26 = smov 1   ;;  %vm1137_vm3 = vcmask 64512  }
  0x29   : > { %847 = vst.msk [vmem:[#allocation2 + $0x10] sm:$0x1] %vm846_vm1, %v1482_v0  ;;  %s1818_s0 = smov (!%p774_p0, %s1589_s0), 1  ;;  %s1418_s19 = sld [smem:[#allocation4 + $0x7]] }
  0x2a   : > { %s1616_s24 = sshll.u32 %s1818_s0, 3  ;;  %s1417_s20 = sld [smem:[#allocation4 + $0x6]] }
  0x2b   : > { %s793_s1 = scalar_lea.vmem %s1795_s6, %s1616_s24  ;;  %s797_s25 = scalar_lea.vmem %s1796_s7, %s1616_s24 }
  0x2c   : > { %v874_v3 = vld [vmem:[%s793_s1] sm:$0xff]  ;;  %s785_s29 = scalar_lea.vmem %s1793_s4, %s1616_s24  ;;  %s801_s21 = scalar_lea.vmem %s1797_s8, %s1616_s24 }
  0x2d   : > { %s777_s28 = scalar_lea.vmem %s1815_s27, %s1616_s24  ;;  %v891_v4 = vld [vmem:[%s797_s25] sm:$0xff]  ;;  %s789_s2 = scalar_lea.vmem %s1794_s5, %s1616_s24 }
  0x2e   : > { %v867_v1 = vld [vmem:[%s777_s28] sm:$0xff]  ;;  %s781_s22 = scalar_lea.vmem %s1816_s3, %s1616_s24  ;;  %s805_s27 = scalar_lea.vmem %s1798_s9, %s1616_s24 }
  0x2f   : > { %869 = vrot.lane.b32.xlu0 %v867_v1, %s1483_s26  ;;  %v885_v2 = vld [vmem:[%s781_s22] sm:$0xff]  ;;  %s825_s1 = scalar_lea.vmem %s1803_s14, %s1616_s24  ;;  %s829_s28 = scalar_lea.vmem %s1804_s15, %s1616_s24  ;;  %v929_v30 = vstv %s1418_s19 }
  0x30   : > { %887 = vrot.lane.b32.xlu1 %v885_v2, %s1483_s26  ;;  %v915_v5 = vld [vmem:[%s785_s29] sm:$0xff]  ;;  %s809_s29 = scalar_lea.vmem %s1799_s10, %s1616_s24  ;;  %s833_s3 = scalar_lea.vmem %s1805_s16, %s1616_s24  ;;  %v956_v45 = vstv %s1417_s20 }
  0x31   : > { %v921_v6 = vld [vmem:[%s801_s21] sm:$0xff]  ;;  %s817_s21 = scalar_lea.vmem %s1801_s12, %s1616_s24  ;;  %s821_s25 = scalar_lea.vmem %s1802_s13, %s1616_s24 }
  0x32   : > { %v939_v7 = vld [vmem:[%s789_s2] sm:$0xff]  ;;  %s813_s2 = scalar_lea.vmem %s1800_s11, %s1616_s24  ;;  %s1426_s22 = sld [smem:[#allocation4 + $0xf]] }
  0x33   : > { %876 = vrot.lane.b32.xlu0 %v874_v3, %s1483_s26  ;;  %v945_v8 = vld [vmem:[%s805_s27] sm:$0xff]  ;;  %s1420_s23 = sld [smem:[#allocation4 + $0x9]]  ;;  %s1415_s27 = sld [smem:[#allocation4 + $0x4]] }
  0x34   : > { %893 = vrot.lane.b32.xlu1 %v891_v4, %s1483_s26  ;;  %v989_v9 = vld [vmem:[%s809_s29] sm:$0xff]  ;;  %s1427_s29 = sld [smem:[#allocation4 + $0x10]]  ;;  %s1424_s19 = sld [smem:[#allocation4 + $0xd]] }
  0x35   : > { %v995_v10 = vld [vmem:[%s825_s1] sm:$0xff]  ;;  %s1421_s1 = sld [smem:[#allocation4 + $0xa]]  ;;  %s1425_s20 = sld [smem:[#allocation4 + $0xe]] }
  0x36   : > { %v1006_v11 = vld [vmem:[%s813_s2] sm:$0xff]  ;;  %s1416_s2 = sld [smem:[#allocation4 + $0x5]] }
  0x37   : > { %917 = vrot.lane.b32.xlu0 %v915_v5, %s1483_s26  ;;  %v1012_v12 = vld [vmem:[%s829_s28] sm:$0xff]  ;;  %s837_s28 = scalar_lea.vmem %s1806_s17, %s1616_s24  ;;  %s1412_s24 = sld [smem:[#allocation4 + $0x1]] }
  0x38   : > { %923 = vrot.lane.b32.xlu1 %v921_v6, %s1483_s26  ;;  %v1036_v13 = vld [vmem:[%s817_s21] sm:$0xff]  ;;  %s848_s21 = sld [smem:[#allocation4]] }
  0x39   : > { %v1042_v14 = vld [vmem:[%s833_s3] sm:$0xff]  ;;  %s1414_s3 = sld [smem:[#allocation4 + $0x3]] }
  0x3a   : > { %v1060_v15 = vld [vmem:[%s821_s25] sm:$0xff]  ;;  %v1050_v0 = vstv %s1427_s29  ;;  %s1423_s25 = sld [smem:[#allocation4 + $0xc]]  ;;  %s1484_s29 = smov 127  }
  0x3b   : > { %941 = vrot.lane.b32.xlu0 %v939_v7, %s1483_s26  ;;  %v1066_v16 = vld [vmem:[%s837_s28] sm:$0xff]  ;;  %v1055_v3 = vstv %s1421_s1  ;;  %s1419_s28 = sld [smem:[#allocation4 + $0x8]]  ;;  %s1431_s1 = sshll.u32 %s1818_s0, 4 }
  0x3c   : > { %947 = vrot.lane.b32.xlu1 %v945_v8, %s1483_s26 }
  0x3d   : > { %v934_v31 = vstv %s1412_s24  ;;  %s1422_s24 = sld [smem:[#allocation4 + $0xb]] }
  0x3e   : > { %v974_v53 = vstv %s848_s21  ;;  %s866_s21 = sld [smem:[#allocation3]] }
  0x3f   : > { %991 = vrot.lane.b32.xlu0 %v989_v9, %s1483_s26  ;;  %v902_v23 = vstv %s1414_s3  ;;  %s1428_s3 = sld [smem:[#allocation4 + $0x11]] }
  0x40   : > { %997 = vrot.lane.b32.xlu1 %v995_v10, %s1483_s26 }
  0x43   : > { %1008 = vrot.lane.b32.xlu0 %v1006_v11, %s1483_s26 }
  0x44   : > { %1014 = vrot.lane.b32.xlu1 %v1012_v12, %s1483_s26 }
  0x47   : > { %1038 = vrot.lane.b32.xlu0 %v1036_v13, %s1483_s26 }
  0x48   : > { %1044 = vrot.lane.b32.xlu1 %v1042_v14, %s1483_s26  ;;  %v1077_v14 = vstv %s1426_s22 }
  0x4b   : > { %1062 = vrot.lane.b32.xlu0 %v1060_v15, %s1483_s26 }
  0x4c   : > { %1068 = vrot.lane.b32.xlu1 %v1066_v16, %s1483_s26 }
  0xa1   : > { %v870_v17 = vpop.permute.xlu0 %869 }
  0xa2   : > { %873 = vst.msk [vmem:[#allocation2 + $0x1] sm:$0xff] %vm872_vm2, %v870_v17  ;;  %v888_v19 = vpop.permute.xlu1 %887 }
  0xa5   : > { %v877_v18 = vpop.permute.xlu0 %876 }
  0xa6   : > { %879 = vst.msk [vmem:[#allocation2 + $0x9] sm:$0xff] %vm872_vm2, %v877_v18  ;;  %v894_v21 = vpop.permute.xlu1 %893 }
  0xa9   : > { %v1700_v20 = vld [vmem:[#allocation2 + $0x1] sm:$0xff]  ;;  %v918_v24 = vpop.permute.xlu0 %917 }
  0xaa   : > { %890 = vst.msk [vmem:[#allocation2 + $0x1] sm:$0xff] %vm872_vm2, %v888_v19  ;;  %v924_v27 = vpop.permute.xlu1 %923 }
  0xad   : > { %v1703_v22 = vld [vmem:[#allocation2 + $0x9] sm:$0xff]  ;;  %v942_v37 = vpop.permute.xlu0 %941 }
  0xae   : > { %896 = vst.msk [vmem:[#allocation2 + $0x9] sm:$0xff] %vm872_vm2, %v894_v21  ;;  %v948_v36 = vpop.permute.xlu1 %947  ;;  %v1095_v21 = vstv %s1420_s23 }
  0xb1   : > { %v1706_v25 = vld [vmem:[#allocation2 + $0x1] sm:$0xff]  ;;  %v992_v46 = vpop.permute.xlu0 %991 }
  0xb2   : > { %v903_v26 = vmul.f32 %v902_v23, %v1706_v25  ;;  %920 = vst.msk [vmem:[#allocation2 + $0x1] sm:$0xff] %vm872_vm2, %v918_v24  ;;  %v998_v44 = vpop.permute.xlu1 %997 }
  0xb4   : > { %907 = vrot.lane.b32.xlu0 %v903_v26, %s1483_s26 }
  0xb5   : > { %v1711_v28 = vld [vmem:[#allocation2 + $0x9] sm:$0xff]  ;;  %v1009_v57 = vpop.permute.xlu0 %1008 }
  0xb6   : > { %926 = vst.msk [vmem:[#allocation2 + $0x9] sm:$0xff] %vm872_vm2, %v924_v27  ;;  %v904_v29 = vmul.f32 %v902_v23, %v1711_v28  ;;  %v1015_v56 = vpop.permute.xlu1 %1014  ;;  %v1023_v27 = vstv %s1423_s25  ;;  %s842_s25 = scalar_lea.vmem %s1807_s18, %s1431_s1 }
  0xb8   : > { %909 = vrot.lane.b32.xlu1 %v904_v29, %s1483_s26 }
  0xb9   : > { %v927_v32 = vld [vmem:[#allocation2 + $0x1] sm:$0xff]  ;;  %v1039_v61 = vpop.permute.xlu0 %1038 }
  0xba   : > { %v932_v33 = vld [vmem:[#allocation2] sm:$0xff]  ;;  %v930_v34 = vmul.f32 %v929_v30, %v927_v32  ;;  %v1045_v60 = vpop.permute.xlu1 %1044  ;;  %v882_v32 = vstv %s1415_s27 }
  0xbb   : > { %v935_v35 = vmul.f32 %v934_v31, %v932_v33 }
  0xbd   : > { %v1716_v38 = vadd.f32 %v935_v35, %v930_v34  ;;  %v933_v39 = vld [vmem:[#allocation2 + $0x8] sm:$0xff]  ;;  %v1063_v2 = vpop.permute.xlu0 %1062  ;;  %v883_v35 = vmul.f32 %v882_v32, %v1700_v20 }
  0xbe   : > { %v928_v40 = vld [vmem:[#allocation2 + $0x9] sm:$0xff]  ;;  %944 = vst.msk [vmem:[#allocation2 + $0x1] sm:$0xff] %vm872_vm2, %v942_v37  ;;  %v936_v42 = vmul.f32 %v934_v31, %v933_v39  ;;  %v1069_v1 = vpop.permute.xlu1 %1068  ;;  %v899_v31 = vstv %s1416_s2 }
  0xbf   : > { %950 = vst.msk [vmem:[#allocation2 + $0x9] sm:$0xff] %vm872_vm2, %v948_v36  ;;  %v931_v41 = vmul.f32 %v929_v30, %v928_v40  ;;  %v900_v33 = vmul.f32 %v899_v31, %v1706_v25  ;;  %v901_v39 = vmul.f32 %v899_v31, %v1711_v28 }
  0xc1   : > { %v1720_v43 = vadd.f32 %v936_v42, %v931_v41  ;;  %v884_v41 = vmul.f32 %v882_v32, %v1703_v22 }
  0xc5   : > { %v1726_v49 = vld [vmem:[#allocation2 + $0x1] sm:$0xff] }
  0xc6   : > { %v1722_v47 = vld [vmem:[#allocation2 + $0x9] sm:$0xff]  ;;  %v957_v51 = vmul.f32 %v956_v45, %v1726_v49  ;;  %v1731_v52 = vld [vmem:[#allocation2] sm:$0xff] }
  0xc7   : > { %v1724_v48 = vld [vmem:[#allocation2 + $0x8] sm:$0xff]  ;;  %v958_v50 = vmul.f32 %v956_v45, %v1722_v47  ;;  %v975_v55 = vmul.f32 %v974_v53, %v1731_v52  ;;  %v953_v45 = vstv %s1419_s28 }
  0xc8   : > { %1000 = vst.msk [vmem:[#allocation2 + $0x9] sm:$0xff] %vm872_vm2, %v998_v44  ;;  %994 = vst.msk [vmem:[#allocation2 + $0x1] sm:$0xff] %vm872_vm2, %v992_v46  ;;  %961 = vrot.lane.b32.xlu0 %v957_v51, %s1483_s26  ;;  %v976_v54 = vmul.f32 %v974_v53, %v1724_v48  ;;  %v955_v25 = vmul.f32 %v953_v45, %v1722_v47  ;;  %v954_v53 = vmul.f32 %v953_v45, %v1726_v49 }
  0xc9   : > { %963 = vrot.lane.b32.xlu1 %v958_v50, %s1483_s26 }
  0xcc   : > { %979 = vrot.lane.b32.xlu0 %v975_v55, %s1483_s26 }
  0xcd   : > { %981 = vrot.lane.b32.xlu1 %v976_v54, %s1483_s26 }
  0xcf   : > { %v1740_v58 = vld [vmem:[#allocation2 + $0x9] sm:$0xff]  ;;  %v1743_v59 = vld [vmem:[#allocation2 + $0x1] sm:$0xff] }
  0xd0   : > { %1017 = vst.msk [vmem:[#allocation2 + $0x9] sm:$0xff] %vm872_vm2, %v1015_v56  ;;  %1011 = vst.msk [vmem:[#allocation2 + $0x1] sm:$0xff] %vm872_vm2, %v1009_v57 }
  0xd7   : > { %v1746_v62 = vld [vmem:[#allocation2 + $0x9] sm:$0xff]  ;;  %v1749_v63 = vld [vmem:[#allocation2 + $0x1] sm:$0xff] }
  0xd8   : > { %1047 = vst.msk [vmem:[#allocation2 + $0x9] sm:$0xff] %vm872_vm2, %v1045_v60  ;;  %1041 = vst.msk [vmem:[#allocation2 + $0x1] sm:$0xff] %vm872_vm2, %v1039_v61  ;;  %v1025_v29 = vmul.f32 %v1023_v27, %v1746_v62  ;;  %v1024_v30 = vmul.f32 %v1023_v27, %v1749_v63 }
  0xdf   : > { %v1049_v4 = vld [vmem:[#allocation2 + $0x9] sm:$0xff]  ;;  %v1048_v5 = vld [vmem:[#allocation2 + $0x1] sm:$0xff] }
  0xe0   : > { %v1053_v6 = vld [vmem:[#allocation2] sm:$0xff]  ;;  %v1054_v7 = vld [vmem:[#allocation2 + $0x8] sm:$0xff]  ;;  %v1052_v8 = vmul.f32 %v1050_v0, %v1049_v4  ;;  %v1051_v10 = vmul.f32 %v1050_v0, %v1048_v5  ;;  %v1092_v4 = vstv %s1422_s24 }
  0xe1   : > { %1071 = vst.msk [vmem:[#allocation2 + $0x9] sm:$0xff] %vm872_vm2, %v1069_v1  ;;  %1065 = vst.msk [vmem:[#allocation2 + $0x1] sm:$0xff] %vm872_vm2, %v1063_v2  ;;  %v1057_v9 = vmul.f32 %v1055_v3, %v1054_v7  ;;  %v1056_v11 = vmul.f32 %v1055_v3, %v1053_v6 }
  0xe3   : > { %v1754_v12 = vadd.f32 %v1057_v9, %v1052_v8  ;;  %v1756_v13 = vadd.f32 %v1056_v11, %v1051_v10  ;;  %v1003_v11 = vstv %s1424_s19 }
  0xe8   : > { %v1073_v15 = vld [vmem:[#allocation2 + $0x9] sm:$0xff]  ;;  %v1072_v16 = vld [vmem:[#allocation2 + $0x1] sm:$0xff] }
  0xe9   : > { %v1079_v17 = vmul.f32 %v1077_v14, %v1073_v15  ;;  %v1078_v18 = vmul.f32 %v1077_v14, %v1072_v16  ;;  %v1091_v19 = vld [vmem:[#allocation2 + $0x8] sm:$0xff]  ;;  %v1090_v23 = vld [vmem:[#allocation2] sm:$0xff] }
  0xea   : > { %v1097_v24 = vmul.f32 %v1095_v21, %v1091_v19  ;;  %v1096_v26 = vmul.f32 %v1095_v21, %v1090_v23  ;;  %v1094_v7 = vmul.f32 %v1092_v4, %v1091_v19  ;;  %v1093_v8 = vmul.f32 %v1092_v4, %v1090_v23 }
  0xeb   : > { %1084 = vrot.lane.b32.xlu1 %v1079_v17, %s1483_s26  ;;  %1082 = vrot.lane.b32.xlu0 %v1078_v18, %s1483_s26  ;;  %v1004_v19 = vmul.f32 %v1003_v11, %v1743_v59 }
  0xef   : > { %1102 = vrot.lane.b32.xlu1 %v1097_v24, %s1483_s26  ;;  %1100 = vrot.lane.b32.xlu0 %v1096_v26, %s1483_s26 }
  0xf3   : > { %1030 = vrot.lane.b32.xlu1 %v1025_v29, %s1483_s26  ;;  %1028 = vrot.lane.b32.xlu0 %v1024_v30, %s1483_s26  ;;  %s1413_s26 = sld [smem:[#allocation4 + $0x2]] }
  0xf9   : > { %v971_v51 = vstv %s1413_s26 }
  0xfa   : > { %v973_v20 = vmul.f32 %v971_v51, %v1724_v48  ;;  %v972_v54 = vmul.f32 %v971_v51, %v1731_v52  ;;  %v1074_v48 = vstv %s1428_s3 }
  0xfb   : > { %v1076_v5 = vmul.f32 %v1074_v48, %v1073_v15  ;;  %v1075_v6 = vmul.f32 %v1074_v48, %v1072_v16  ;;  %v1005_v15 = vmul.f32 %v1003_v11, %v1740_v58 }
 0x126   : > { %v908_v34 = vpop.permute.xlu0 %907 }
 0x127   : > { %v913_v36 = vadd.f32 %v908_v34, %v900_v33 }
 0x129   : > { %v1110_v37 = vadd.f32 %v913_v36, %v883_v35 }
 0x12a   : > { %v910_v40 = vpop.permute.xlu1 %909 }
 0x12b   : > { %v914_v42 = vadd.f32 %v910_v40, %v901_v39 }
 0x12d   : > { %v1111_v44 = vadd.f32 %v914_v42, %v884_v41 }
 0x13a   : > { %v962_v50 = vpop.permute.xlu0 %961 }
 0x13b   : > { %v964_v46 = vpop.permute.xlu1 %963  ;;  %v967_v22 = vadd.f32 %v962_v50, %v954_v53 }
 0x13c   : > { %v968_v56 = vadd.f32 %v964_v46, %v955_v25 }
 0x13e   : > { %v980_v55 = vpop.permute.xlu0 %979 }
 0x13f   : > { %v982_v28 = vpop.permute.xlu1 %981  ;;  %v985_v60 = vadd.f32 %v980_v55, %v972_v54 }
 0x140   : > { %v986_v57 = vadd.f32 %v982_v28, %v973_v20 }
 0x141   : > { %v987_v0 = vadd.f32 %v985_v60, %v967_v22 }
 0x142   : > { %v988_v61 = vadd.f32 %v986_v57, %v968_v56 }
 0x143   : > { %v1112_v2 = vadd.f32 %v987_v0, %v1716_v38 }
 0x144   : > { %v1113_v1 = vadd.f32 %v988_v61, %v1720_v43  ;;  %v1020_v43 = vstv %s1425_s20 }
 0x145   : > { %v1114_v47 = vadd.f32 %v1112_v2, %v1110_v37  ;;  %v1022_v26 = vmul.f32 %v1020_v43, %v1746_v62  ;;  %v1021_v27 = vmul.f32 %v1020_v43, %v1749_v63  ;;  %v1124_v62 = vstv %s866_s21 }
 0x146   : > { %v1115_v3 = vadd.f32 %v1113_v1, %v1111_v44 }
 0x15d   : > { %v1085_v49 = vpop.permute.xlu1 %1084  ;;  %v1083_v52 = vpop.permute.xlu0 %1082 }
 0x15e   : > { %v1089_v14 = vadd.f32 %v1085_v49, %v1076_v5  ;;  %v1088_v38 = vadd.f32 %v1083_v52, %v1075_v6 }
 0x161   : > { %v1103_v9 = vpop.permute.xlu1 %1102  ;;  %v1101_v10 = vpop.permute.xlu0 %1100 }
 0x162   : > { %v1107_v17 = vadd.f32 %v1103_v9, %v1094_v7  ;;  %v1106_v18 = vadd.f32 %v1101_v10, %v1093_v8 }
 0x164   : > { %v1109_v21 = vadd.f32 %v1107_v17, %v1089_v14  ;;  %v1108_v24 = vadd.f32 %v1106_v18, %v1088_v38 }
 0x165   : > { %v1031_v16 = vpop.permute.xlu1 %1030  ;;  %v1029_v23 = vpop.permute.xlu0 %1028 }
 0x166   : > { %v1119_v29 = vadd.f32 %v1109_v21, %v1754_v12  ;;  %v1118_v30 = vadd.f32 %v1108_v24, %v1756_v13  ;;  %v1035_v31 = vadd.f32 %v1031_v16, %v1022_v26  ;;  %v1034_v32 = vadd.f32 %v1029_v23, %v1021_v27 }
 0x168   : > { %v1117_v33 = vadd.f32 %v1035_v31, %v1005_v15  ;;  %v1116_v34 = vadd.f32 %v1034_v32, %v1004_v19 }
 0x16a   : > { %v1121_v35 = vadd.f32 %v1119_v29, %v1117_v33  ;;  %v1120_v36 = vadd.f32 %v1118_v30, %v1116_v34 }
 0x16c   : > { %v1123_v37 = vadd.f32 %v1121_v35, %v1115_v3  ;;  %v1122_v63 = vadd.f32 %v1120_v36, %v1114_v47 }
 0x16e   : > { %v1126_v39 = vadd.f32 %v1124_v62, %v1123_v37  ;;  %v1125_v58 = vadd.f32 %v1124_v62, %v1122_v63 }
 0x170   : > { %v1128_v40 = vand.u32 2147483647, %v1126_v39  ;;  %v1127_v41 = vand.u32 2147483647, %v1125_v58 }
 0x172   : > { %1133 = vrot.lane.b32.xlu1 %v1128_v40, %s1484_s29  ;;  %1131 = vrot.lane.b32.xlu0 %v1127_v41, %s1484_s29 }
 0x1e4   : > { %v1134_v59 = vpop.permute.xlu1 %1133  ;;  %v1132_v12 = vpop.permute.xlu0 %1131 }
 0x1e5   : > { %1139 = vst.msk [vmem:[%s842_s25 + $0x8] sm:$0xff] %vm1137_vm3, %v1134_v59  ;;  %1138 = vst.msk [vmem:[%s842_s25] sm:$0xff] %vm1137_vm3, %v1132_v12 }
 0x1e6 PF: > { %s30_s30 = sadd.s32 1, %s1479_s30  }
 0x1e7   : > { %p27_p1 = scmp.ge.s32.totalorder %s30_s30, 4  }
 0x1e9   :  { %29 = sbr.rel (!%p27_p1) target bundleno = 11 (0xb), region = 172 }
 0x1f0   :  { %1161 = vsyncpa [#allocation5], 1 }
 0x1f1   :  { %1163 = vsyncpa [#allocation5 + $0x1], 1 }

</bundles_post_ra>
